<compile_context>
chip_gen: v6e
topology: v6e:2x2x1
jax: 0.10.0
libtpu: 0.0.40
codegen_flags: <defaults>
</compile_context>

<pallas_src>
import jax
import jax.numpy as jnp
import numpy as np
from jax.experimental import pallas as pl
from jax.experimental.pallas import tpu as pltpu


# ----------------------------- Pallas kernels -------------------------------
def _make_conv1_kernel(h, n1):
    """Stage 1: transposed conv as 2 banded GEMMs + BN1 partial stats.

    xq_ref : [1, H+1, (W+1)*C0] f32  per-image resident, rows flattened W*C0
    w_ref  : [2, (W+1)*C0, 2*Wo*cout] bf16  banded phase weights (resident)
    y_ref  : [1, H, 2*Wo*cout]  f32  row i packs upsampled rows (2i, 2i+1)
    st_ref : [1, 2, 2*Wo*cout]  f32  per-image [sum ; sum of squares] lanes
    """
    def kernel(xq_ref, w_ref, y_ref, st_ref):
        acc = jnp.zeros((h, n1), jnp.float32)
        for dh in range(2):                                   # 2 GEMMs, K=(W+1)*C0
            lhs = xq_ref[0, pl.ds(dh, h), :].astype(jnp.bfloat16)
            acc = acc + jnp.dot(lhs, w_ref[dh],
                                preferred_element_type=jnp.float32)
        y_ref[0] = acc
        st_ref[0, 0:1, :] = jnp.sum(acc, axis=0, keepdims=True)
        st_ref[0, 1:2, :] = jnp.sum(acc * acc, axis=0, keepdims=True)
    return kernel


def _make_conv2_kernel(ho, lw, k2):
    """Stage 2: BN1 affine + ReLU (once per image, into padded scratch) then
    3x3 conv as 3 banded GEMMs + BN2 partial stats.

    y1_ref : [1, Ho, Wo*cout] f32  raw stage-1 output (depth-to-space lanes)
    sc_ref/sh_ref : [1, Wo*cout]   BN1 fused scale/shift tiled per column
    w_ref  : [3, (Wo+2)*cout, Wo*cout] bf16  banded conv weights (resident)
    y2_ref : [1, Ho, Wo*cout] f32
    st_ref : [1, 2, Wo*cout]  f32
    zp_ref : VMEM scratch [Ho+2, (Wo+2)*cout] f32 zero-padded activation
             (conv-transpose / conv biases omitted: cancelled exactly by the
              training-mode BN batch mean)
    """
    def kernel(y1_ref, sc_ref, sh_ref, w_ref, y2_ref, st_ref, zp_ref):
        zp_ref[...] = jnp.zeros(zp_ref.shape, zp_ref.dtype)
        act = jnp.maximum(y1_ref[0] * sc_ref[...] + sh_ref[...], 0.0)
        zp_ref[pl.ds(1, ho), pl.ds(0, lw)] = act
        acc = jnp.zeros((ho, lw), jnp.float32)
        for kh in range(3):                                   # 3 GEMMs, K=(Wo+2)*cout
            lhs = zp_ref[pl.ds(kh, ho), :].astype(jnp.bfloat16)
            acc = acc + jnp.dot(lhs, w_ref[kh],
                                preferred_element_type=jnp.float32)
        y2_ref[0] = acc
        st_ref[0, 0:1, :] = jnp.sum(acc, axis=0, keepdims=True)
        st_ref[0, 1:2, :] = jnp.sum(acc * acc, axis=0, keepdims=True)
    return kernel


def _bn_relu_kernel(y_ref, sc_ref, sh_ref, o_ref):
    """Stage 3: BN2 affine + ReLU2 on lane-dense [Ho, Wo*cout] tiles."""
    o_ref[0] = jnp.maximum(y_ref[0] * sc_ref[...] + sh_ref[...], 0.0)


# -------------------------- banded GEMM weights ------------------------------
def _phase_weights(wT, w, c0, cout):
    """ConvTranspose2d(k=3,s=2,p=1,op=1) -> per-dh banded GEMM weights.

    Row index  : jin*C0 + cin           (flattened padded input row, jin=j+dw)
    Col index  : ph*(2W*cout) + (2j+pw)*cout + c   (two upsampled rows packed)
    """
    # (phase, tap delta) -> kernel index of the equivalent forward conv.
    tap = {(0, 0): 1, (1, 0): 2, (1, 1): 0}
    sel = np.zeros((2, w + 1, 2, w, 2, 3, 3), np.float32)  # [dh,jin,ph,j,pw,KH,KW]
    for (ph, dh), kh in tap.items():
        for (pw, dw), kw in tap.items():
            for j in range(w):
                sel[dh, j + dw, ph, j, pw, kh, kw] = 1.0
    w1b = jnp.einsum("depnqfg,icfg->deipnqc", sel, wT)       # wT: [C0,cout,3,3]
    return w1b.reshape(2, (w + 1) * c0, 2 * (2 * w) * cout)


def _conv2_weights(wC, wo, cout):
    """Conv2d(cout,cout,3,pad=1) -> per-kh banded GEMM weights.

    Row index  : q*cout + cin   (flattened act row; data lanes [0,Wo*cout),
                                 trailing lanes are zero)
    Col index  : oj*cout + c
    """
    sel = np.zeros((3, wo + 2, wo, 3), np.float32)           # [kh,q,oj,kw]
    for oj in range(wo):
        for kw in range(3):
            q = oj + kw - 1
            if q >= 0:                                       # q = -1 is the left zero pad
                sel[:, q, oj, kw] = 1.0
    w2b = jnp.einsum("kqjw,ackw->kqcja", sel, wC)            # wC: [out,in,3,3]
    return w2b.reshape(3, (wo + 2) * cout, wo * cout)


# ------------------------------ UpBlock glue --------------------------------
def upblock_forward(x_nchw, skip_nchw, params):
    f32, bf16 = jnp.float32, jnp.bfloat16
    n, cin_half, h, w = x_nchw.shape
    cout = params["wC"].shape[0]
    c0 = 2 * cin_half
    ho, wo = 2 * h, 2 * w
    kin = (w + 1) * c0           # stage-1 GEMM K   (=136 here)
    lw = wo * cout               # one upsampled row on lanes (=128 here)
    n1 = 2 * lw                  # stage-1 GEMM N: two output rows per input row
    k2 = (wo + 2) * cout         # stage-2 GEMM K   (=136 here)

    cparams = pltpu.CompilerParams(
        dimension_semantics=("parallel",),          # one image per grid step
        vmem_limit_bytes=32 * 1024 * 1024)          # explicit; fits v5e/v6e/v7x

    # NCHW -> NHWC, channel concat, flatten W*C0 onto lanes, (bottom,right) pad.
    x = jnp.transpose(x_nchw, (0, 2, 3, 1)).astype(f32)
    sk = jnp.transpose(skip_nchw, (0, 2, 3, 1)).astype(f32)
    xc = jnp.concatenate([x, sk], axis=-1).reshape(n, h, w * c0)
    xq = jnp.pad(xc, ((0, 0), (0, 1), (0, c0)))              # [n, h+1, kin]

    w1b = _phase_weights(params["wT"].astype(f32), w, c0, cout).astype(bf16)

    y1, st1 = pl.pallas_call(
        _make_conv1_kernel(h, n1),
        out_shape=(jax.ShapeDtypeStruct((n, h, n1), f32),
                   jax.ShapeDtypeStruct((n, 2, n1), f32)),
        grid=(n,),
        in_specs=[pl.BlockSpec((1, h + 1, kin), lambda i: (i, 0, 0)),
                  pl.BlockSpec((2, kin, n1), lambda i: (0, 0, 0))],
        out_specs=(pl.BlockSpec((1, h, n1), lambda i: (i, 0, 0)),
                   pl.BlockSpec((1, 2, n1), lambda i: (i, 0, 0))),
        compiler_params=cparams,
    )(xq, w1b)

    # ---- BN1 batch statistics (tiny XLA fold of per-image lane partials) ----
    # NOTE: one-pass E[x^2]-E[x]^2 (clamped at 0).  Adequate for post-conv
    # activations where |mean| ~ std; use a shifted reduction if reused where
    # |mean| >> std.  ConvT bias dropped: cancelled by the batch mean.
    m1 = n * ho * wo
    p1 = jnp.sum(st1, axis=0)                                # [2, n1]
    sum1 = p1[0].reshape(-1, cout).sum(axis=0)
    ssq1 = p1[1].reshape(-1, cout).sum(axis=0)
    mean1 = sum1 / m1
    var1 = jnp.maximum(ssq1 / m1 - mean1 * mean1, 0.0)
    inv1 = jax.lax.rsqrt(var1 + 1e-5)
    sc1 = jnp.tile(params["g1"] * inv1, wo).reshape(1, lw).astype(f32)
    sh1 = jnp.tile(params["be1"] - mean1 * params["g1"] * inv1, wo
                   ).reshape(1, lw).astype(f32)

    # [n, h, 2*lw] -> [n, ho, lw]: free row-major reshape (depth-to-space was
    # already realized on lanes by the stage-1 column ordering).
    y1r = y1.reshape(n, ho, lw)

    w2b = _conv2_weights(params["wC"].astype(f32), wo, cout).astype(bf16)

    y2, st2 = pl.pallas_call(
        _make_conv2_kernel(ho, lw, k2),
        out_shape=(jax.ShapeDtypeStruct((n, ho, lw), f32),
                   jax.ShapeDtypeStruct((n, 2, lw), f32)),
        grid=(n,),
        in_specs=[pl.BlockSpec((1, ho, lw), lambda i: (i, 0, 0)),
                  pl.BlockSpec((1, lw), lambda i: (0, 0)),
                  pl.BlockSpec((1, lw), lambda i: (0, 0)),
                  pl.BlockSpec((3, k2, lw), lambda i: (0, 0, 0))],
        out_specs=(pl.BlockSpec((1, ho, lw), lambda i: (i, 0, 0)),
                   pl.BlockSpec((1, 2, lw), lambda i: (i, 0, 0))),
        scratch_shapes=[pltpu.VMEM((ho + 2, k2), f32)],
        compiler_params=cparams,
    )(y1r, sc1, sh1, w2b)

    # ---- BN2 batch statistics ------------------------------------------------
    m2 = n * ho * wo
    p2 = jnp.sum(st2, axis=0)
    sum2 = p2[0].reshape(-1, cout).sum(axis=0)
    ssq2 = p2[1].reshape(-1, cout).sum(axis=0)
    mean2 = sum2 / m2
    var2 = jnp.maximum(ssq2 / m2 - mean2 * mean2, 0.0)
    inv2 = jax.lax.rsqrt(var2 + 1e-5)
    sc2 = jnp.tile(params["g2"] * inv2, wo).reshape(1, lw).astype(f32)
    sh2 = jnp.tile(params["be2"] - mean2 * params["g2"] * inv2, wo
                   ).reshape(1, lw).astype(f32)

    z = pl.pallas_call(
        _bn_relu_kernel,
        out_shape=jax.ShapeDtypeStruct((n, ho, lw), f32),
        grid=(n,),
        in_specs=[pl.BlockSpec((1, ho, lw), lambda i: (i, 0, 0)),
                  pl.BlockSpec((1, lw), lambda i: (0, 0)),
                  pl.BlockSpec((1, lw), lambda i: (0, 0))],
        out_specs=pl.BlockSpec((1, ho, lw), lambda i: (i, 0, 0)),
        compiler_params=cparams,
    )(y2, sc2, sh2)

    z = z.reshape(n, ho, wo, cout)
    return jnp.transpose(z, (0, 3, 1, 2))                    # back to NCHW


# ------------------------------ reference -----------------------------------
def _bn_relu_ref(y_nchw, g, b):
    mean = y_nchw.mean(axis=(0, 2, 3), keepdims=True)
    var = ((y_nchw - mean) ** 2).mean(axis=(0, 2, 3), keepdims=True)
    yh = (y_nchw - mean) / jnp.sqrt(var + 1e-5)
    return jnp.maximum(g[None, :, None, None] * yh + b[None, :, None, None], 0.0)


def upblock_reference(x_nchw, skip_nchw, params):
    xc = jnp.concatenate([x_nchw, skip_nchw], axis=1)
    wt = params["wT"]
    w1 = jnp.transpose(wt, (1, 0, 2, 3))[:, :, ::-1, ::-1]
    y = jax.lax.conv_general_dilated(
        xc, w1, window_strides=(1, 1), padding=((1, 2), (1, 2)),
        lhs_dilation=(2, 2),
        dimension_numbers=("NCHW", "OIHW", "NCHW")) + params["bT"][None, :, None, None]
    y = _bn_relu_ref(y, params["g1"], params["be1"])
    z = jax.lax.conv_general_dilated(
        y, params["wC"], window_strides=(1, 1), padding=((1, 1), (1, 1)),
        dimension_numbers=("NCHW", "OIHW", "NCHW")) + params["bC"][None, :, None, None]
    return _bn_relu_ref(z, params["g2"], params["be2"])


# --------------------------------- main --------------------------------------
if __name__ == "__main__":
    in_ch, out_ch = 4, 4
    N, H, W = 2, 16, 16

    key = jax.random.PRNGKey(0)
    k1, k2, k3, k4, k5, k6 = jax.random.split(key, 6)

    x = jax.random.normal(k1, (N, in_ch, H, W), jnp.float32)      # NCHW
    skip = jax.random.normal(k2, (N, in_ch, H, W), jnp.float32)   # NCHW

    params = {
        "wT": 0.2 * jax.random.normal(k3, (2 * in_ch, out_ch, 3, 3), jnp.float32),
        "bT": 0.1 * jax.random.normal(k4, (out_ch,), jnp.float32),
        "wC": 0.2 * jax.random.normal(k5, (out_ch, out_ch, 3, 3), jnp.float32),
        "bC": 0.1 * jax.random.normal(k6, (out_ch,), jnp.float32),
        "g1": jnp.ones((out_ch,), jnp.float32),
        "be1": jnp.zeros((out_ch,), jnp.float32),
        "g2": jnp.ones((out_ch,), jnp.float32),
        "be2": jnp.zeros((out_ch,), jnp.float32),
    }

    out = jax.block_until_ready(jax.jit(upblock_forward)(x, skip, params))
    ref = jax.block_until_ready(upblock_reference(x, skip, params))

    assert out.shape == (N, out_ch, 2 * H, 2 * W), out.shape
    # Tolerance sized for bf16 MXU operands (f32 accumulation) vs f32 reference.
    err = float(np.max(np.abs(np.asarray(out) - np.asarray(ref))))
    assert np.allclose(np.asarray(out), np.asarray(ref), rtol=5e-2, atol=5e-2), err
    print("KERNEL_OK")
</pallas_src>

<mosaic_0001>
module attributes {stable_mosaic.version = 11 : i64} {
  func.func @kernel(%arg0: i32, %arg1: memref<1x17x136xf32, #tpu.memory_space<vmem>>, %arg2: memref<2x136x256xbf16, #tpu.memory_space<vmem>>, %arg3: memref<1x16x256xf32, #tpu.memory_space<vmem>>, %arg4: memref<1x2x256xf32, #tpu.memory_space<vmem>>) attributes {dimension_semantics = [#tpu.dimension_semantics<parallel>], iteration_bounds = array<i64: 2>, scalar_prefetch = 0 : i64, scratch_operands = 0 : i64, tpu.core_type = #tpu.core_type<tc>, window_params = [{transform_indices = @transform_0, window_bounds = array<i64: 1, 17, 136>}, {pipeline_mode = #tpu.pipeline_mode<synchronous>, transform_indices = @transform_1, window_bounds = array<i64: 2, 136, 256>}, {transform_indices = @transform_2, window_bounds = array<i64: 1, 16, 256>}, {transform_indices = @transform_3, window_bounds = array<i64: 1, 2, 256>}]} {
    %cst = arith.constant 0.000000e+00 : f32
    %0 = vector.broadcast %cst : f32 to vector<16x256xf32>
    %c0 = arith.constant 0 : index
    %c0_0 = arith.constant 0 : index
    %c0_1 = arith.constant 0 : index
    %1 = vector.load %arg1[%c0, %c0_0, %c0_1] : memref<1x17x136xf32, #tpu.memory_space<vmem>>, vector<1x16x136xf32>
    %2 = vector.shape_cast %1 : vector<1x16x136xf32> to vector<16x136xf32>
    %3 = arith.truncf %2 : vector<16x136xf32> to vector<16x136xbf16>
    %c0_2 = arith.constant 0 : index
    %c0_3 = arith.constant 0 : index
    %c0_4 = arith.constant 0 : index
    %4 = vector.load %arg2[%c0_2, %c0_3, %c0_4] : memref<2x136x256xbf16, #tpu.memory_space<vmem>>, vector<1x136x256xbf16>
    %5 = vector.shape_cast %4 : vector<1x136x256xbf16> to vector<136x256xbf16>
    %cst_5 = arith.constant dense<0.000000e+00> : vector<16x256xf32>
    %6 = tpu.matmul %3, %5, %cst_5 {dimension_numbers = #tpu.dot_dimension_numbers<[1], [0], [0], [1], [0, 0, 1, 1], [], []>} : vector<16x136xbf16>, vector<136x256xbf16>, vector<16x256xf32> -> vector<16x256xf32>
    %7 = arith.addf %0, %6 : vector<16x256xf32>
    %c0_6 = arith.constant 0 : index
    %c1 = arith.constant 1 : index
    %c0_7 = arith.constant 0 : index
    %8 = vector.load %arg1[%c0_6, %c1, %c0_7] : memref<1x17x136xf32, #tpu.memory_space<vmem>>, vector<1x16x136xf32>
    %9 = vector.shape_cast %8 : vector<1x16x136xf32> to vector<16x136xf32>
    %10 = arith.truncf %9 : vector<16x136xf32> to vector<16x136xbf16>
    %c1_8 = arith.constant 1 : index
    %c0_9 = arith.constant 0 : index
    %c0_10 = arith.constant 0 : index
    %11 = vector.load %arg2[%c1_8, %c0_9, %c0_10] : memref<2x136x256xbf16, #tpu.memory_space<vmem>>, vector<1x136x256xbf16>
    %12 = vector.shape_cast %11 : vector<1x136x256xbf16> to vector<136x256xbf16>
    %cst_11 = arith.constant dense<0.000000e+00> : vector<16x256xf32>
    %13 = tpu.matmul %10, %12, %cst_11 {dimension_numbers = #tpu.dot_dimension_numbers<[1], [0], [0], [1], [0, 0, 1, 1], [], []>} : vector<16x136xbf16>, vector<136x256xbf16>, vector<16x256xf32> -> vector<16x256xf32>
    %14 = arith.addf %7, %13 : vector<16x256xf32>
    %c0_12 = arith.constant 0 : index
    %c0_13 = arith.constant 0 : index
    %c0_14 = arith.constant 0 : index
    %15 = vector.load %arg3[%c0_12, %c0_13, %c0_14] : memref<1x16x256xf32, #tpu.memory_space<vmem>>, vector<1x16x256xf32>
    %16 = vector.shape_cast %15 : vector<1x16x256xf32> to vector<16x256xf32>
    %17 = vector.shape_cast %14 : vector<16x256xf32> to vector<1x16x256xf32>
    tpu.vector_store %arg3[%c0_12, %c0_13, %c0_14], %17 {strides = array<i32>} : memref<1x16x256xf32, #tpu.memory_space<vmem>>, vector<1x16x256xf32>,
    %cst_15 = arith.constant dense<0.000000e+00> : vector<256xf32>
    %18 = vector.multi_reduction <add>, %14, %cst_15 [0] : vector<16x256xf32> to vector<256xf32>
    %19 = vector.shape_cast %18 : vector<256xf32> to vector<1x256xf32>
    %c0_16 = arith.constant 0 : index
    %c0_17 = arith.constant 0 : index
    %c0_18 = arith.constant 0 : index
    %20 = vector.load %arg4[%c0_16, %c0_17, %c0_18] : memref<1x2x256xf32, #tpu.memory_space<vmem>>, vector<1x1x256xf32>
    %21 = vector.shape_cast %20 : vector<1x1x256xf32> to vector<1x256xf32>
    %22 = vector.shape_cast %19 : vector<1x256xf32> to vector<1x1x256xf32>
    tpu.vector_store %arg4[%c0_16, %c0_17, %c0_18], %22 {strides = array<i32>} : memref<1x2x256xf32, #tpu.memory_space<vmem>>, vector<1x1x256xf32>,
    %23 = arith.mulf %14, %14 : vector<16x256xf32>
    %cst_19 = arith.constant dense<0.000000e+00> : vector<256xf32>
    %24 = vector.multi_reduction <add>, %23, %cst_19 [0] : vector<16x256xf32> to vector<256xf32>
    %25 = vector.shape_cast %24 : vector<256xf32> to vector<1x256xf32>
    %c0_20 = arith.constant 0 : index
    %c1_21 = arith.constant 1 : index
    %c0_22 = arith.constant 0 : index
    %26 = vector.load %arg4[%c0_20, %c1_21, %c0_22] : memref<1x2x256xf32, #tpu.memory_space<vmem>>, vector<1x1x256xf32>
    %27 = vector.shape_cast %26 : vector<1x1x256xf32> to vector<1x256xf32>
    %28 = vector.shape_cast %25 : vector<1x256xf32> to vector<1x1x256xf32>
    tpu.vector_store %arg4[%c0_20, %c1_21, %c0_22], %28 {strides = array<i32>} : memref<1x2x256xf32, #tpu.memory_space<vmem>>, vector<1x1x256xf32>,
    return
  }
  func.func @transform_0(%arg0: i32) -> (i32, i32, i32) {
    %c0_i32 = arith.constant 0 : i32
    %c0_i32_0 = arith.constant 0 : i32
    %c0_i32_1 = arith.constant 0 : i32
    return %arg0, %c0_i32, %c0_i32_0 : i32, i32, i32
  }
  func.func @transform_1(%arg0: i32) -> (i32, i32, i32) {
    %c0_i32 = arith.constant 0 : i32
    %c0_i32_0 = arith.constant 0 : i32
    %c0_i32_1 = arith.constant 0 : i32
    %c0_i32_2 = arith.constant 0 : i32
    return %c0_i32, %c0_i32_0, %c0_i32_1 : i32, i32, i32
  }
  func.func @transform_2(%arg0: i32) -> (i32, i32, i32) {
    %c0_i32 = arith.constant 0 : i32
    %c0_i32_0 = arith.constant 0 : i32
    %c0_i32_1 = arith.constant 0 : i32
    return %arg0, %c0_i32, %c0_i32_0 : i32, i32, i32
  }
  func.func @transform_3(%arg0: i32) -> (i32, i32, i32) {
    %c0_i32 = arith.constant 0 : i32
    %c0_i32_0 = arith.constant 0 : i32
    %c0_i32_1 = arith.constant 0 : i32
    return %arg0, %c0_i32, %c0_i32_0 : i32, i32, i32
  }
}

module attributes {stable_mosaic.version = 11 : i64} {
  func.func @kernel(%arg0: i32, %arg1: memref<1x32x128xf32, #tpu.memory_space<vmem>>, %arg2: memref<1x128xf32, #tpu.memory_space<vmem>>, %arg3: memref<1x128xf32, #tpu.memory_space<vmem>>, %arg4: memref<3x136x128xbf16, #tpu.memory_space<vmem>>, %arg5: memref<1x32x128xf32, #tpu.memory_space<vmem>>, %arg6: memref<1x2x128xf32, #tpu.memory_space<vmem>>, %arg7: memref<34x136xf32, #tpu.memory_space<vmem>>) attributes {dimension_semantics = [#tpu.dimension_semantics<parallel>], iteration_bounds = array<i64: 2>, scalar_prefetch = 0 : i64, scratch_operands = 1 : i64, tpu.core_type = #tpu.core_type<tc>, window_params = [{transform_indices = @transform_0, window_bounds = array<i64: 1, 32, 128>}, {pipeline_mode = #tpu.pipeline_mode<synchronous>, transform_indices = @transform_1, window_bounds = array<i64: 1, 128>}, {pipeline_mode = #tpu.pipeline_mode<synchronous>, transform_indices = @transform_2, window_bounds = array<i64: 1, 128>}, {pipeline_mode = #tpu.pipeline_mode<synchronous>, transform_indices = @transform_3, window_bounds = array<i64: 3, 136, 128>}, {transform_indices = @transform_4, window_bounds = array<i64: 1, 32, 128>}, {transform_indices = @transform_5, window_bounds = array<i64: 1, 2, 128>}]} {
    %cst = arith.constant 0.000000e+00 : f32
    %0 = vector.broadcast %cst : f32 to vector<34x136xf32>
    %c0 = arith.constant 0 : index
    %c0_0 = arith.constant 0 : index
    %1 = vector.load %arg7[%c0, %c0_0] : memref<34x136xf32, #tpu.memory_space<vmem>>, vector<34x136xf32>
    tpu.vector_store %arg7[%c0, %c0_0], %0 {strides = array<i32>} : memref<34x136xf32, #tpu.memory_space<vmem>>, vector<34x136xf32>,
    %c0_1 = arith.constant 0 : index
    %c0_2 = arith.constant 0 : index
    %c0_3 = arith.constant 0 : index
    %2 = vector.load %arg1[%c0_1, %c0_2, %c0_3] : memref<1x32x128xf32, #tpu.memory_space<vmem>>, vector<1x32x128xf32>
    %3 = vector.shape_cast %2 : vector<1x32x128xf32> to vector<32x128xf32>
    %c0_4 = arith.constant 0 : index
    %c0_5 = arith.constant 0 : index
    %4 = vector.load %arg2[%c0_4, %c0_5] : memref<1x128xf32, #tpu.memory_space<vmem>>, vector<1x128xf32>
    %5 = vector.broadcast %4 : vector<1x128xf32> to vector<32x128xf32>
    %6 = arith.mulf %3, %5 : vector<32x128xf32>
    %c0_6 = arith.constant 0 : index
    %c0_7 = arith.constant 0 : index
    %7 = vector.load %arg3[%c0_6, %c0_7] : memref<1x128xf32, #tpu.memory_space<vmem>>, vector<1x128xf32>
    %8 = vector.broadcast %7 : vector<1x128xf32> to vector<32x128xf32>
    %9 = arith.addf %6, %8 : vector<32x128xf32>
    %cst_8 = arith.constant 0.000000e+00 : f32
    %10 = vector.broadcast %cst_8 : f32 to vector<32x128xf32>
    %11 = arith.maximumf %9, %10 : vector<32x128xf32>
    %c1 = arith.constant 1 : index
    %c0_9 = arith.constant 0 : index
    %12 = vector.load %arg7[%c1, %c0_9] : memref<34x136xf32, #tpu.memory_space<vmem>>, vector<32x128xf32>
    tpu.vector_store %arg7[%c1, %c0_9], %11 {strides = array<i32>} : memref<34x136xf32, #tpu.memory_space<vmem>>, vector<32x128xf32>,
    %cst_10 = arith.constant 0.000000e+00 : f32
    %13 = vector.broadcast %cst_10 : f32 to vector<32x128xf32>
    %c0_11 = arith.constant 0 : index
    %c0_12 = arith.constant 0 : index
    %14 = vector.load %arg7[%c0_11, %c0_12] : memref<34x136xf32, #tpu.memory_space<vmem>>, vector<32x136xf32>
    %15 = arith.truncf %14 : vector<32x136xf32> to vector<32x136xbf16>
    %c0_13 = arith.constant 0 : index
    %c0_14 = arith.constant 0 : index
    %c0_15 = arith.constant 0 : index
    %16 = vector.load %arg4[%c0_13, %c0_14, %c0_15] : memref<3x136x128xbf16, #tpu.memory_space<vmem>>, vector<1x136x128xbf16>
    %17 = vector.shape_cast %16 : vector<1x136x128xbf16> to vector<136x128xbf16>
    %cst_16 = arith.constant dense<0.000000e+00> : vector<32x128xf32>
    %18 = tpu.matmul %15, %17, %cst_16 {dimension_numbers = #tpu.dot_dimension_numbers<[1], [0], [0], [1], [0, 0, 1, 1], [], []>} : vector<32x136xbf16>, vector<136x128xbf16>, vector<32x128xf32> -> vector<32x128xf32>
    %19 = arith.addf %13, %18 : vector<32x128xf32>
    %c1_17 = arith.constant 1 : index
    %c0_18 = arith.constant 0 : index
    %20 = vector.load %arg7[%c1_17, %c0_18] : memref<34x136xf32, #tpu.memory_space<vmem>>, vector<32x136xf32>
    %21 = arith.truncf %20 : vector<32x136xf32> to vector<32x136xbf16>
    %c1_19 = arith.constant 1 : index
    %c0_20 = arith.constant 0 : index
    %c0_21 = arith.constant 0 : index
    %22 = vector.load %arg4[%c1_19, %c0_20, %c0_21] : memref<3x136x128xbf16, #tpu.memory_space<vmem>>, vector<1x136x128xbf16>
    %23 = vector.shape_cast %22 : vector<1x136x128xbf16> to vector<136x128xbf16>
    %cst_22 = arith.constant dense<0.000000e+00> : vector<32x128xf32>
    %24 = tpu.matmul %21, %23, %cst_22 {dimension_numbers = #tpu.dot_dimension_numbers<[1], [0], [0], [1], [0, 0, 1, 1], [], []>} : vector<32x136xbf16>, vector<136x128xbf16>, vector<32x128xf32> -> vector<32x128xf32>
    %25 = arith.addf %19, %24 : vector<32x128xf32>
    %c2 = arith.constant 2 : index
    %c0_23 = arith.constant 0 : index
    %26 = vector.load %arg7[%c2, %c0_23] : memref<34x136xf32, #tpu.memory_space<vmem>>, vector<32x136xf32>
    %27 = arith.truncf %26 : vector<32x136xf32> to vector<32x136xbf16>
    %c2_24 = arith.constant 2 : index
    %c0_25 = arith.constant 0 : index
    %c0_26 = arith.constant 0 : index
    %28 = vector.load %arg4[%c2_24, %c0_25, %c0_26] : memref<3x136x128xbf16, #tpu.memory_space<vmem>>, vector<1x136x128xbf16>
    %29 = vector.shape_cast %28 : vector<1x136x128xbf16> to vector<136x128xbf16>
    %cst_27 = arith.constant dense<0.000000e+00> : vector<32x128xf32>
    %30 = tpu.matmul %27, %29, %cst_27 {dimension_numbers = #tpu.dot_dimension_numbers<[1], [0], [0], [1], [0, 0, 1, 1], [], []>} : vector<32x136xbf16>, vector<136x128xbf16>, vector<32x128xf32> -> vector<32x128xf32>
    %31 = arith.addf %25, %30 : vector<32x128xf32>
    %c0_28 = arith.constant 0 : index
    %c0_29 = arith.constant 0 : index
    %c0_30 = arith.constant 0 : index
    %32 = vector.load %arg5[%c0_28, %c0_29, %c0_30] : memref<1x32x128xf32, #tpu.memory_space<vmem>>, vector<1x32x128xf32>
    %33 = vector.shape_cast %32 : vector<1x32x128xf32> to vector<32x128xf32>
    %34 = vector.shape_cast %31 : vector<32x128xf32> to vector<1x32x128xf32>
    tpu.vector_store %arg5[%c0_28, %c0_29, %c0_30], %34 {strides = array<i32>} : memref<1x32x128xf32, #tpu.memory_space<vmem>>, vector<1x32x128xf32>,
    %cst_31 = arith.constant dense<0.000000e+00> : vector<128xf32>
    %35 = vector.multi_reduction <add>, %31, %cst_31 [0] : vector<32x128xf32> to vector<128xf32>
    %36 = vector.shape_cast %35 : vector<128xf32> to vector<1x128xf32>
    %c0_32 = arith.constant 0 : index
    %c0_33 = arith.constant 0 : index
    %c0_34 = arith.constant 0 : index
    %37 = vector.load %arg6[%c0_32, %c0_33, %c0_34] : memref<1x2x128xf32, #tpu.memory_space<vmem>>, vector<1x1x128xf32>
    %38 = vector.shape_cast %37 : vector<1x1x128xf32> to vector<1x128xf32>
    %39 = vector.shape_cast %36 : vector<1x128xf32> to vector<1x1x128xf32>
    tpu.vector_store %arg6[%c0_32, %c0_33, %c0_34], %39 {strides = array<i32>} : memref<1x2x128xf32, #tpu.memory_space<vmem>>, vector<1x1x128xf32>,
    %40 = arith.mulf %31, %31 : vector<32x128xf32>
    %cst_35 = arith.constant dense<0.000000e+00> : vector<128xf32>
    %41 = vector.multi_reduction <add>, %40, %cst_35 [0] : vector<32x128xf32> to vector<128xf32>
    %42 = vector.shape_cast %41 : vector<128xf32> to vector<1x128xf32>
    %c0_36 = arith.constant 0 : index
    %c1_37 = arith.constant 1 : index
    %c0_38 = arith.constant 0 : index
    %43 = vector.load %arg6[%c0_36, %c1_37, %c0_38] : memref<1x2x128xf32, #tpu.memory_space<vmem>>, vector<1x1x128xf32>
    %44 = vector.shape_cast %43 : vector<1x1x128xf32> to vector<1x128xf32>
    %45 = vector.shape_cast %42 : vector<1x128xf32> to vector<1x1x128xf32>
    tpu.vector_store %arg6[%c0_36, %c1_37, %c0_38], %45 {strides = array<i32>} : memref<1x2x128xf32, #tpu.memory_space<vmem>>, vector<1x1x128xf32>,
    return
  }
  func.func @transform_0(%arg0: i32) -> (i32, i32, i32) {
    %c0_i32 = arith.constant 0 : i32
    %c0_i32_0 = arith.constant 0 : i32
    %c0_i32_1 = arith.constant 0 : i32
    return %arg0, %c0_i32, %c0_i32_0 : i32, i32, i32
  }
  func.func @transform_1(%arg0: i32) -> (i32, i32) {
    %c0_i32 = arith.constant 0 : i32
    %c0_i32_0 = arith.constant 0 : i32
    %c0_i32_1 = arith.constant 0 : i32
    return %c0_i32, %c0_i32_0 : i32, i32
  }
  func.func @transform_2(%arg0: i32) -> (i32, i32) {
    %c0_i32 = arith.constant 0 : i32
    %c0_i32_0 = arith.constant 0 : i32
    %c0_i32_1 = arith.constant 0 : i32
    return %c0_i32, %c0_i32_0 : i32, i32
  }
  func.func @transform_3(%arg0: i32) -> (i32, i32, i32) {
    %c0_i32 = arith.constant 0 : i32
    %c0_i32_0 = arith.constant 0 : i32
    %c0_i32_1 = arith.constant 0 : i32
    %c0_i32_2 = arith.constant 0 : i32
    return %c0_i32, %c0_i32_0, %c0_i32_1 : i32, i32, i32
  }
  func.func @transform_4(%arg0: i32) -> (i32, i32, i32) {
    %c0_i32 = arith.constant 0 : i32
    %c0_i32_0 = arith.constant 0 : i32
    %c0_i32_1 = arith.constant 0 : i32
    return %arg0, %c0_i32, %c0_i32_0 : i32, i32, i32
  }
  func.func @transform_5(%arg0: i32) -> (i32, i32, i32) {
    %c0_i32 = arith.constant 0 : i32
    %c0_i32_0 = arith.constant 0 : i32
    %c0_i32_1 = arith.constant 0 : i32
    return %arg0, %c0_i32, %c0_i32_0 : i32, i32, i32
  }
}

module attributes {stable_mosaic.version = 11 : i64} {
  func.func @_bn_relu_kernel(%arg0: i32, %arg1: memref<1x32x128xf32, #tpu.memory_space<vmem>>, %arg2: memref<1x128xf32, #tpu.memory_space<vmem>>, %arg3: memref<1x128xf32, #tpu.memory_space<vmem>>, %arg4: memref<1x32x128xf32, #tpu.memory_space<vmem>>) attributes {dimension_semantics = [#tpu.dimension_semantics<parallel>], iteration_bounds = array<i64: 2>, scalar_prefetch = 0 : i64, scratch_operands = 0 : i64, tpu.core_type = #tpu.core_type<tc>, window_params = [{transform_indices = @transform_0, window_bounds = array<i64: 1, 32, 128>}, {pipeline_mode = #tpu.pipeline_mode<synchronous>, transform_indices = @transform_1, window_bounds = array<i64: 1, 128>}, {pipeline_mode = #tpu.pipeline_mode<synchronous>, transform_indices = @transform_2, window_bounds = array<i64: 1, 128>}, {transform_indices = @transform_3, window_bounds = array<i64: 1, 32, 128>}]} {
    %c0 = arith.constant 0 : index
    %c0_0 = arith.constant 0 : index
    %c0_1 = arith.constant 0 : index
    %0 = vector.load %arg1[%c0, %c0_0, %c0_1] : memref<1x32x128xf32, #tpu.memory_space<vmem>>, vector<1x32x128xf32>
    %1 = vector.shape_cast %0 : vector<1x32x128xf32> to vector<32x128xf32>
    %c0_2 = arith.constant 0 : index
    %c0_3 = arith.constant 0 : index
    %2 = vector.load %arg2[%c0_2, %c0_3] : memref<1x128xf32, #tpu.memory_space<vmem>>, vector<1x128xf32>
    %3 = vector.broadcast %2 : vector<1x128xf32> to vector<32x128xf32>
    %4 = arith.mulf %1, %3 : vector<32x128xf32>
    %c0_4 = arith.constant 0 : index
    %c0_5 = arith.constant 0 : index
    %5 = vector.load %arg3[%c0_4, %c0_5] : memref<1x128xf32, #tpu.memory_space<vmem>>, vector<1x128xf32>
    %6 = vector.broadcast %5 : vector<1x128xf32> to vector<32x128xf32>
    %7 = arith.addf %4, %6 : vector<32x128xf32>
    %cst = arith.constant 0.000000e+00 : f32
    %8 = vector.broadcast %cst : f32 to vector<32x128xf32>
    %9 = arith.maximumf %7, %8 : vector<32x128xf32>
    %c0_6 = arith.constant 0 : index
    %c0_7 = arith.constant 0 : index
    %c0_8 = arith.constant 0 : index
    %10 = vector.load %arg4[%c0_6, %c0_7, %c0_8] : memref<1x32x128xf32, #tpu.memory_space<vmem>>, vector<1x32x128xf32>
    %11 = vector.shape_cast %10 : vector<1x32x128xf32> to vector<32x128xf32>
    %12 = vector.shape_cast %9 : vector<32x128xf32> to vector<1x32x128xf32>
    tpu.vector_store %arg4[%c0_6, %c0_7, %c0_8], %12 {strides = array<i32>} : memref<1x32x128xf32, #tpu.memory_space<vmem>>, vector<1x32x128xf32>,
    return
  }
  func.func @transform_0(%arg0: i32) -> (i32, i32, i32) {
    %c0_i32 = arith.constant 0 : i32
    %c0_i32_0 = arith.constant 0 : i32
    %c0_i32_1 = arith.constant 0 : i32
    return %arg0, %c0_i32, %c0_i32_0 : i32, i32, i32
  }
  func.func @transform_1(%arg0: i32) -> (i32, i32) {
    %c0_i32 = arith.constant 0 : i32
    %c0_i32_0 = arith.constant 0 : i32
    %c0_i32_1 = arith.constant 0 : i32
    return %c0_i32, %c0_i32_0 : i32, i32
  }
  func.func @transform_2(%arg0: i32) -> (i32, i32) {
    %c0_i32 = arith.constant 0 : i32
    %c0_i32_0 = arith.constant 0 : i32
    %c0_i32_1 = arith.constant 0 : i32
    return %c0_i32, %c0_i32_0 : i32, i32
  }
  func.func @transform_3(%arg0: i32) -> (i32, i32, i32) {
    %c0_i32 = arith.constant 0 : i32
    %c0_i32_0 = arith.constant 0 : i32
    %c0_i32_1 = arith.constant 0 : i32
    return %arg0, %c0_i32, %c0_i32_0 : i32, i32, i32
  }
}

</mosaic_0001>

<bundles_post_ra>
// kernel: upblock_forward.3
= control target key start
LH: loop header
LB: loop body
LE: loop exit
PB: predicated region body
PF: predicated region fallthrough
CT: control target
= control target key end

     0   :  { %s866_s12 = smov 0   ;;  %s1011_s0 = inlined_call_operand.vmem [shape: f32[2,17,136], index: 0, kind: input, shape index: {}]   ;;  %s1012_s1 = inlined_call_operand.vmem [shape: bf16[2,136,256], index: 1, kind: input, shape index: {}]   ;;  %s1013_s2 = inlined_call_operand.vmem [shape: f32[2,16,256], index: 2, kind: output, shape index: {0}]   ;;  %s1014_s3 = inlined_call_operand.vmem [shape: f32[2,2,256], index: 3, kind: output, shape index: {1}]  }
   0x1 LB: > { %s703_s13 = sadd.s32 4294967295, %s843_s12   ;;  %p707_p0 = scmp.ge.s32.totalorder %s843_s12, 1  ;;  %s843_s12 = sphi %s866_s12, %s14_s12  }
   0x2   : > { %p140_p1 = scmp.lt.s32.totalorder %s843_s12, 3 }
   0x4   : > { %p141_p2 = pnand %p707_p0, %p140_p1 }
   0x5   : > { %p169_p3 = scmp.lt.s32.totalorder (!%p141_p2), %s703_s13, 1 }
   0x6   : > { %144 = sbr.rel (%p141_p2) target bundleno = 273 (0x111), region = 28 }
   0xb   : > { %v785_v0 = vld [vmem:[%s1012_s1 + $0xfc] ss:$8 sps:$4 sm:$0xff]   ;;  %v789_v2 = vld [vmem:[%s1012_s1 + $0xf8] ss:$8 sps:$4 sm:$0xff]   ;;  %v791_v4 = vld [vmem:[%s1012_s1 + $0xec] ss:$8 sps:$4 sm:$0xff]  }
   0xc   : > { %v787_v1 = vld [vmem:[%s1012_s1 + $0x74] ss:$8 sps:$4 sm:$0xff]   ;;  %356 = vmatprep.subr.bf16.mxu0 %v785_v0  ;;  %v790_v3 = vld [vmem:[%s1012_s1 + $0x70] ss:$8 sps:$4 sm:$0xff]   ;;  %v793_v5 = vld [vmem:[%s1012_s1 + $0x64] ss:$8 sps:$4 sm:$0xff]  }
   0xd   : > { %493 = vmatprep.subr.bf16.mxu1 %v787_v1  ;;  %357 = vmatpush1.bf16.msra.mxu0 %v789_v2  ;;  %v795_v6 = vld [vmem:[%s1012_s1 + $0xe8] ss:$8 sps:$4 sm:$0xff]   ;;  %v797_v8 = vld [vmem:[%s1012_s1 + $0xdc] ss:$8 sps:$4 sm:$0xff]   ;;  %v801_v10 = vld [vmem:[%s1012_s1 + $0xd8] ss:$8 sps:$4 sm:$0xff]  }
   0xe   : > { %494 = vmatpush1.bf16.msra.mxu1 %v790_v3  ;;  %358 = vmatprep.subr.bf16.mxu0 %v791_v4  ;;  %v796_v7 = vld [vmem:[%s1012_s1 + $0x60] ss:$8 sps:$4 sm:$0xff]   ;;  %v799_v9 = vld [vmem:[%s1012_s1 + $0x54] ss:$8 sps:$4 sm:$0xff]   ;;  %v802_v11 = vld [vmem:[%s1012_s1 + $0x50] ss:$8 sps:$4 sm:$0xff]  }
   0xf   : > { %495 = vmatprep.subr.bf16.mxu1 %v793_v5  ;;  %v803_v12 = vld [vmem:[%s1012_s1 + $0xcc] ss:$8 sps:$4 sm:$0xff]   ;;  %v807_v14 = vld [vmem:[%s1012_s1 + $0xc8] ss:$8 sps:$4 sm:$0xff]   ;;  %s1016_s13 = smov (!%p169_p3, %s703_s13), 1  ;;  %vm345_vm0 = vcmask 64512  }
  0x10   : > { %v805_v13 = vld [vmem:[%s1012_s1 + $0x44] ss:$8 sps:$4 sm:$0xff]   ;;  %v808_v15 = vld [vmem:[%s1012_s1 + $0x40] ss:$8 sps:$4 sm:$0xff]   ;;  %v811_v17 = vld [vmem:[%s1012_s1 + $0x34] ss:$8 sps:$4 sm:$0xff]  }
  0x11   : > { %359 = vmatpush1.bf16.msra.mxu0 %v795_v6  ;;  %v809_v16 = vld [vmem:[%s1012_s1 + $0xbc] ss:$8 sps:$4 sm:$0xff]   ;;  %v813_v18 = vld [vmem:[%s1012_s1 + $0xb8] ss:$8 sps:$4 sm:$0xff]   ;;  %s775_s29 = smul.u32 48, %s1016_s13  ;;  %v729_v37 = vld [vmem:[%s1012_s1 + $0x108] sm:$0xff] }
  0x12   : > { %496 = vmatpush1.bf16.msra.mxu1 %v796_v7  ;;  %360 = vmatprep.subr.bf16.mxu0 %v797_v8  ;;  %v814_v19 = vld [vmem:[%s1012_s1 + $0x30] ss:$8 sps:$4 sm:$0xff]   ;;  %v815_v20 = vld [vmem:[%s1012_s1 + $0xac] ss:$8 sps:$4 sm:$0xff]   ;;  %v820_v23 = vld [vmem:[%s1012_s1 + $0x20] ss:$8 sps:$4 sm:$0xff]   ;;  %v747_v49 = vcombine.high %v729_v37, %v729_v37  ;;  %v746_v57 = vcombine.low %v729_v37, %v729_v37 }
  0x13   : > { %497 = vmatprep.subr.bf16.mxu1 %v799_v9  ;;  %v817_v21 = vld [vmem:[%s1012_s1 + $0x24] ss:$8 sps:$4 sm:$0xff]   ;;  %s950_s9 = scalar_lea.vmem %s1011_s0, %s775_s29  ;;  %v819_v22 = vld [vmem:[%s1012_s1 + $0xa8] ss:$8 sps:$4 sm:$0xff]   ;;  %v823_v25 = vld [vmem:[%s1012_s1 + $0x14] ss:$8 sps:$4 sm:$0xff]  }
  0x14   : > { %v821_v24 = vld [vmem:[%s1012_s1 + $0x9c] ss:$8 sps:$4 sm:$0xff]   ;;  %v825_v26 = vld [vmem:[%s1012_s1 + $0x98] ss:$8 sps:$4 sm:$0xff]   ;;  %v209_v29 = vld [vmem:[%s950_s9 + $0x8] sm:$0xfe] }
  0x15   : > { %361 = vmatpush1.bf16.msra.mxu0 %v801_v10  ;;  %v826_v27 = vld [vmem:[%s1012_s1 + $0x10] ss:$8 sps:$4 sm:$0xff]   ;;  %v211_v30 = vld [vmem:[%s950_s9 + $0x28] sm:$0x1]  ;;  %v208_v35 = vld [vmem:[%s950_s9] sm:$0xfe] }
  0x16   : > { %498 = vmatpush1.bf16.msra.mxu1 %v802_v11  ;;  %362 = vmatprep.subr.bf16.mxu0 %v803_v12  ;;  %v188_v28 = vld [vmem:[%s950_s9 + $0x18] sm:$0xff]  ;;  %v215_v32 = vpack.c.bf16 %v211_v30, %v211_v30  ;;  %v186_v33 = vld [vmem:[%s950_s9 + $0x8] sm:$0xff]  ;;  %v187_v34 = vld [vmem:[%s950_s9 + $0x10] sm:$0xff]  ;;  %vm234_vm1 = vsmask.f32 7424  ;;  %vm349_vm2 = vcmask 1043456   ;;  %v560_v30 = vlaneseq }
  0x17   : > { %499 = vmatprep.subr.bf16.mxu1 %v805_v13  ;;  %v213_v31 = vpack.c.bf16 %v188_v28, %v209_v29  ;;  %v827_v36 = vld [vmem:[%s1012_s1 + $0x8c] ss:$8 sps:$4 sm:$0xff]   ;;  %v190_v38 = vpack.c.bf16 %v188_v28, %v186_v33  ;;  %v210_v39 = vld [vmem:[%s950_s9 + $0x20] sm:$0x1]  ;;  %v212_v40 = vpack.c.bf16 %v187_v34, %v208_v35  ;;  %v831_v48 = vld [vmem:[%s1012_s1 + $0x88] ss:$8 sps:$4 sm:$0xff]  }
  0x18   : > { %v829_v41 = vld [vmem:[%s1012_s1 + $0x4] ss:$8 sps:$4 sm:$0xff]   ;;  %v255_v45 = vshll.u32 %v215_v32, 16  ;;  %v214_v46 = vpack.c.bf16 %v210_v39, %v210_v39  ;;  %v832_v52 = vld [vmem:[%s1012_s1] ss:$8 sps:$4 sm:$0xff]   ;;  %v351_v0 = vsel %vm349_vm2, %v746_v57, 0 }
  0x19   : > { %363 = vmatpush1.bf16.msra.mxu0 %v807_v14  ;;  %v207_v42 = vld [vmem:[%s1012_s1 + $0x80] sm:$0xff]  ;;  %v248_v43 = vshrl.u32 %v213_v31, 16  ;;  %v250_v44 = vshll.u32 %v213_v31, 16  ;;  %769 = vmatprep.mubr.msk.bf16.mxu1 %vm345_vm0, %v190_v38  ;;  %v238_v47 = vshll.u32 %v212_v40, 16  ;;  %v236_v54 = vshrl.u32 %v212_v40, 16  ;;  %s773_s10 = sshll.u32 %s1016_s13, 5 }
  0x1a   : > { %500 = vmatpush1.bf16.msra.mxu1 %v808_v15  ;;  %364 = vmatprep.subr.bf16.mxu0 %v809_v16  ;;  %v257_v51 = vrot.slane %v255_v45, 1  ;;  %v767_v53 = vcombine.high %v207_v42, %v207_v42  ;;  %v243_v56 = vshll.u32 %v214_v46, 16  ;;  %v766_v58 = vcombine.low %v207_v42, %v207_v42  ;;  %v185_v63 = vld [vmem:[%s950_s9] sm:$0xff]  ;;  %s178_s15 = scalar_lea.vmem %s1013_s2, %s773_s10  ;;  %s774_s9 = sshll.u32 %s1016_s13, 2 }
  0x1b   : > { %501 = vmatprep.subr.bf16.mxu1 %v811_v17  ;;  %v252_v50 = vrot.slane %v250_v44, 1  ;;  %v240_v55 = vrot.slane %v238_v47, 1  ;;  %v189_v2 = vpack.c.bf16 %v187_v34, %v185_v63  ;;  %v845_v28 = vmov 1966171168   ;;  %s183_s18 = scalar_lea.vmem %s1014_s3, %s774_s9 }
  0x1c   : > { %v245_v62 = vrot.slane %v243_v56, 1  ;;  %v488_v1 = vsel %vm349_vm2, %v766_v58, 0  ;;  %v558_v29 = vunpack.c.l.s4 %v845_v28  ;;  %v561_v40 = vshrl.u32 %v560_v30, 7 }
  0x1d   : > { %365 = vmatpush1.bf16.msra.mxu0 %v813_v18  ;;  %v253_v59 = vor.u32 %v252_v50, %v248_v43  ;;  %v241_v61 = vor.u32 %v240_v55, %v236_v54  ;;  %vm574_vm3 = vcmp.lt.s32.totalorder %v560_v30, 256 }
  0x1e   : > { %502 = vmatpush1.bf16.msra.mxu1 %v814_v19  ;;  %366 = vmatprep.subr.bf16.mxu0 %v815_v20  ;;  %v559_v39 = vunpack.c.0.s8 %v558_v29 }
  0x1f   : > { %503 = vmatprep.subr.bf16.mxu1 %v817_v21  ;;  %v258_v60 = vsel %vm234_vm1, %v253_v59, %v257_v51  ;;  %v246_v3 = vsel %vm234_vm1, %v241_v61, %v245_v62 }
  0x20   : > { %749 = vmatprep.mubr.msk.bf16.mxu0 %vm345_vm0, %v258_v60  ;;  %v562_v50 = vsub.s32 %v559_v39, %v561_v40 }
  0x21   : > { %367 = vmatpush1.bf16.msra.mxu0 %v819_v22 }
  0x22   : > { %504 = vmatpush1.bf16.msra.mxu1 %v820_v23  ;;  %368 = vmatprep.subr.bf16.mxu0 %v821_v24 }
  0x23   : > { %505 = vmatprep.subr.bf16.mxu1 %v823_v25 }
  0x25   : > { %369 = vmatpush1.bf16.msra.mxu0 %v825_v26 }
  0x26   : > { %506 = vmatpush1.bf16.msra.mxu1 %v826_v27  ;;  %370 = vmatprep.subr.bf16.mxu0 %v827_v36 }
  0x27   : > { %507 = vmatprep.subr.bf16.mxu1 %v829_v41 }
  0x29   : > { %371 = vmatpush1.bf16.msra.mxu0 %v831_v48 }
  0x2a   : > { %508 = vmatpush1.bf16.msra.mxu1 %v832_v52  ;;  %748 = vmatprep.subr.msk.bf16.mxu0 %vm349_vm2, %v747_v49 }
  0x2b   : > { %768 = vmatprep.subr.msk.bf16.mxu1 %vm349_vm2, %v767_v53 }
  0x2d   : > { %387 = vmatpush2.bf16.msra.mxu0 %v351_v0 }
  0x2e   : > { %524 = vmatpush2.bf16.msra.mxu1 %v488_v1 }
  0x30   : > { %389 = vmatmul.mubr.bf16.vlgmr.msra.gmra.mxu0 %v246_v3 }
  0x31   : > { %526 = vmatmul.mubr.bf16.vlgmr.msra.gmra.mxu1 %v189_v2 }
  0xf0   : > { %v390_v4 = vpop.f32.mrf.mxu0 }
  0xf1   : > { %v527_v5 = vpop.f32.mrf.mxu1 }
  0xf2   : > { %v528_v6 = vadd.f32 %v527_v5, %v390_v4  ;;  %v392_v7 = vpop.f32.mrf.mxu0 }
  0xf3   : > { %v529_v8 = vpop.f32.mrf.mxu1 }
  0xf4   : > { %536 = vst [vmem:[%s178_s15] sm:$0xff] %v528_v6  ;;  %v530_v9 = vadd.f32 %v529_v8, %v392_v7  ;;  %v394_v10 = vpop.f32.mrf.mxu0  ;;  %v577_v15 = vmul.f32 %v528_v6, %v528_v6 }
  0xf5   : > { %v531_v11 = vpop.f32.mrf.mxu1 }
  0xf6   : > { %537 = vst [vmem:[%s178_s15 + $0x8] sm:$0xff] %v530_v9  ;;  %v532_v12 = vadd.f32 %v531_v11, %v394_v10  ;;  %v396_v13 = vpop.f32.mrf.mxu0  ;;  %v578_v19 = vmul.f32 %v530_v9, %v530_v9 }
  0xf7   : > { %v533_v14 = vpop.f32.mrf.mxu1 }
  0xf8   : > { %538 = vst [vmem:[%s178_s15 + $0x10] sm:$0xff] %v532_v12  ;;  %v540_v16 = vadd.f32 %v532_v12, %v528_v6  ;;  %v579_v17 = vmul.f32 %v532_v12, %v532_v12  ;;  %v534_v18 = vadd.f32 %v533_v14, %v396_v13 }
  0xfa   : > { %v541_v20 = vrot.slane %v540_v16, 4  ;;  %v581_v21 = vadd.f32 %v579_v17, %v577_v15  ;;  %539 = vst [vmem:[%s178_s15 + $0x18] sm:$0xff] %v534_v18  ;;  %v547_v22 = vadd.f32 %v534_v18, %v530_v9  ;;  %v580_v23 = vmul.f32 %v534_v18, %v534_v18 }
  0xfc   : > { %v542_v24 = vadd.f32 %v541_v20, %v540_v16  ;;  %v582_v25 = vrot.slane %v581_v21, 4  ;;  %v548_v26 = vrot.slane %v547_v22, 4  ;;  %v588_v27 = vadd.f32 %v580_v23, %v578_v19 }
  0xfe   : > { %v543_v31 = vrot.slane %v542_v24, 2  ;;  %v583_v32 = vadd.f32 %v582_v25, %v581_v21  ;;  %v549_v33 = vadd.f32 %v548_v26, %v547_v22  ;;  %v589_v34 = vrot.slane %v588_v27, 4 }
 0x100   : > { %v544_v35 = vadd.f32 %v543_v31, %v542_v24  ;;  %v584_v36 = vrot.slane %v583_v32, 2  ;;  %v550_v37 = vrot.slane %v549_v33, 2  ;;  %v590_v38 = vadd.f32 %v589_v34, %v588_v27 }
 0x102   : > { %v545_v41 = vrot.slane %v544_v35, 1  ;;  %v585_v42 = vadd.f32 %v584_v36, %v583_v32  ;;  %v551_v43 = vadd.f32 %v550_v37, %v549_v33  ;;  %v591_v44 = vrot.slane %v590_v38, 2 }
 0x104   : > { %v586_v45 = vrot.slane %v585_v42, 1  ;;  %v552_v46 = vrot.slane %v551_v43, 1  ;;  %v592_v47 = vadd.f32 %v591_v44, %v590_v38  ;;  %v546_v48 = vadd.f32 %v545_v41, %v544_v35 }
 0x106   : > { %v553_v49 = vadd.f32 %v552_v46, %v551_v43  ;;  %v593_v51 = vrot.slane %v592_v47, 1  ;;  %v587_v52 = vadd.f32 %v586_v45, %v585_v42 }
 0x108   : > { %v556_v53 = vcombine.low %v546_v48, %v553_v49  ;;  %v594_v54 = vadd.f32 %v593_v51, %v592_v47 }
 0x10a   : > { %v563_v55 = vrot.slane %v556_v53, %v562_v50  ;;  %v597_v56 = vcombine.low %v587_v52, %v594_v54 }
 0x10c   : > { %v570_v57 = vrot.slane %v563_v55, %v562_v50  ;;  %v604_v58 = vrot.slane %v597_v56, %v562_v50 }
 0x10e   : > { %576 = vst.msk [vmem:[%s183_s18] ss:$2 sm:$0x3] %vm574_vm3, %v570_v57  ;;  %v611_v59 = vrot.slane %v604_v58, %v562_v50 }
 0x110   : > { %770 = vst.msk [vmem:[%s183_s18 + $0x1] ss:$2 sm:$0x3] %vm574_vm3, %v611_v59 }
 0x111 PF: > { %s14_s12 = sadd.s32 1, %s843_s12  }
 0x112   : > { %p11_p4 = scmp.ge.s32.totalorder %s14_s12, 4  }
 0x114   :  { %13 = sbr.rel (!%p11_p4) target bundleno = 1 (0x1), region = 72 }

// kernel: squeeze.4
= control target key start
LH: loop header
LB: loop body
LE: loop exit
PB: predicated region body
PF: predicated region fallthrough
CT: control target
= control target key end

     0   :  { %s355_s8 = smov 116   ;;  %s356_s9 = smov 120   ;;  %vm8_vm0 = vcmask 31744   ;;  %s654_s0 = inlined_call_operand.vmem [shape: f32[256], index: 0, kind: input, shape index: {}]   ;;  %s655_s1 = inlined_call_operand.vmem [shape: f32[64,4], index: 1, kind: output, shape index: {}]  }
   0x1   :  { %v5_v0 = vld [vmem:[%s654_s0] sm:$0x3]  ;;  %s354_s0 = smov 124   ;;  %s357_s10 = smov 112  }
   0x2   :  { %6 = vst [vmem:[#allocation0] sm:$0x3] %v5_v0  ;;  %s358_s11 = smov 108   ;;  %s359_s12 = smov 104  }
   0x3   :  { %s360_s13 = smov 100   ;;  %s361_s14 = smov 96  }
   0x4   :  { %s362_s15 = smov 92   ;;  %s363_s16 = smov 88  }
   0x5   :  { %s364_s17 = smov 84   ;;  %s365_s18 = smov 80  }
   0x6   :  { %s366_s19 = smov 76   ;;  %s367_s20 = smov 72  }
   0x7   :  { %s368_s21 = smov 68   ;;  %s369_s22 = smov 64  }
   0x8   :  { %s370_s23 = smov 60   ;;  %s371_s24 = smov 56  }
   0x9   :  { %v12_v1 = vld [vmem:[#allocation0] sm:$0x3]   ;;  %s372_s25 = smov 52   ;;  %s373_s26 = smov 48  }
   0xa   :  { %v28_v2 = vld [vmem:[#allocation0] sm:$0x3]   ;;  %13 = vrot.lane.b32.xlu0 %v12_v1, %s354_s0  ;;  %s374_s27 = smov 44   ;;  %s375_s28 = smov 40  }
   0xb   :  { %29 = vrot.lane.b32.xlu1 %v28_v2, %s355_s8  ;;  %v20_v3 = vld [vmem:[#allocation0] sm:$0x3]   ;;  %s376_s29 = smov 36   ;;  %s377_s30 = smov 32  }
   0xc   :  { %v36_v4 = vld [vmem:[#allocation0] sm:$0x3]   ;;  %s378_s6 = smov 28   ;;  %s379_s7 = smov 24  }
   0xd   :  { %v44_v5 = vld [vmem:[#allocation0] sm:$0x3]   ;;  %s380_s0 = smov 20   ;;  %s381_s8 = smov 16  }
   0xe   :  { %21 = vrot.lane.b32.xlu0 %v20_v3, %s356_s9  ;;  %v52_v6 = vld [vmem:[#allocation0] sm:$0x3]   ;;  %s382_s9 = smov 12  }
   0xf   :  { %37 = vrot.lane.b32.xlu1 %v36_v4, %s357_s10  ;;  %v60_v7 = vld [vmem:[#allocation0] sm:$0x3]   ;;  %s383_s10 = smov 8  }
  0x10   :  { %v68_v8 = vld [vmem:[#allocation0] sm:$0x3]  }
  0x11   :  { %v76_v9 = vld [vmem:[#allocation0] sm:$0x3]  }
  0x12   :  { %45 = vrot.lane.b32.xlu0 %v44_v5, %s358_s11  ;;  %v84_v10 = vld [vmem:[#allocation0] sm:$0x3]   ;;  %s384_s11 = smov 4  }
  0x13   :  { %53 = vrot.lane.b32.xlu1 %v52_v6, %s359_s12  ;;  %v92_v11 = vld [vmem:[#allocation0] sm:$0x3]  }
  0x14   :  { %v100_v12 = vld [vmem:[#allocation0] sm:$0x3]  }
  0x15   :  { %v108_v13 = vld [vmem:[#allocation0] sm:$0x3]  }
  0x16   :  { %61 = vrot.lane.b32.xlu0 %v60_v7, %s360_s13  ;;  %v116_v14 = vld [vmem:[#allocation0] sm:$0x3]  }
  0x17   :  { %69 = vrot.lane.b32.xlu1 %v68_v8, %s361_s14  ;;  %v124_v15 = vld [vmem:[#allocation0] sm:$0x3]  }
  0x18   :  { %v132_v16 = vld [vmem:[#allocation0] sm:$0x3]  }
  0x19   :  { %v140_v17 = vld [vmem:[#allocation0] sm:$0x3]  }
  0x1a   :  { %77 = vrot.lane.b32.xlu0 %v76_v9, %s362_s15  ;;  %v148_v18 = vld [vmem:[#allocation0] sm:$0x3]  }
  0x1b   :  { %85 = vrot.lane.b32.xlu1 %v84_v10, %s363_s16  ;;  %v156_v19 = vld [vmem:[#allocation0] sm:$0x3]  }
  0x1c   :  { %v164_v20 = vld [vmem:[#allocation0] sm:$0x3]  }
  0x1d   :  { %v172_v21 = vld [vmem:[#allocation0] sm:$0x3]  }
  0x1e   :  { %93 = vrot.lane.b32.xlu0 %v92_v11, %s364_s17  ;;  %v180_v22 = vld [vmem:[#allocation0] sm:$0x3]  }
  0x1f   :  { %101 = vrot.lane.b32.xlu1 %v100_v12, %s365_s18  ;;  %v188_v23 = vld [vmem:[#allocation0] sm:$0x3]  }
  0x20   :  { %v196_v24 = vld [vmem:[#allocation0] sm:$0x3]  }
  0x21   :  { %v204_v25 = vld [vmem:[#allocation0] sm:$0x3]  }
  0x22   :  { %109 = vrot.lane.b32.xlu0 %v108_v13, %s366_s19  ;;  %v212_v26 = vld [vmem:[#allocation0] sm:$0x3]  }
  0x23   :  { %117 = vrot.lane.b32.xlu1 %v116_v14, %s367_s20  ;;  %v7_v27 = vld [vmem:[#allocation0] sm:$0x3]  }
  0x24   :  { %9 = vst.msk [vmem:[%s655_s1] sm:$0x1] %vm8_vm0, %v7_v27   ;;  %260 = vst.msk [vmem:[%s655_s1 + $0x1f] sm:$0x2] %vm8_vm0, %v7_v27   ;;  %v220_v28 = vld [vmem:[#allocation0] sm:$0x3]  }
  0x25   :  { %v228_v29 = vld [vmem:[#allocation0] sm:$0x3]  }
  0x26   :  { %125 = vrot.lane.b32.xlu0 %v124_v15, %s368_s21  ;;  %v236_v30 = vld [vmem:[#allocation0] sm:$0x3]  }
  0x27   :  { %133 = vrot.lane.b32.xlu1 %v132_v16, %s369_s22  ;;  %v244_v31 = vld [vmem:[#allocation0] sm:$0x3]  }
  0x28   :  { %v252_v32 = vld [vmem:[#allocation0] sm:$0x3]  }
  0x2a   :  { %141 = vrot.lane.b32.xlu0 %v140_v17, %s370_s23 }
  0x2b   :  { %149 = vrot.lane.b32.xlu1 %v148_v18, %s371_s24 }
  0x2e   :  { %157 = vrot.lane.b32.xlu0 %v156_v19, %s372_s25 }
  0x2f   :  { %165 = vrot.lane.b32.xlu1 %v164_v20, %s373_s26 }
  0x32   :  { %173 = vrot.lane.b32.xlu0 %v172_v21, %s374_s27 }
  0x33   :  { %181 = vrot.lane.b32.xlu1 %v180_v22, %s375_s28 }
  0x36   :  { %189 = vrot.lane.b32.xlu0 %v188_v23, %s376_s29 }
  0x37   :  { %197 = vrot.lane.b32.xlu1 %v196_v24, %s377_s30 }
  0x3a   :  { %205 = vrot.lane.b32.xlu0 %v204_v25, %s378_s6 }
  0x3b   :  { %213 = vrot.lane.b32.xlu1 %v212_v26, %s379_s7 }
  0x3e   :  { %221 = vrot.lane.b32.xlu0 %v220_v28, %s380_s0 }
  0x3f   :  { %229 = vrot.lane.b32.xlu1 %v228_v29, %s381_s8 }
  0x42   :  { %237 = vrot.lane.b32.xlu0 %v236_v30, %s382_s9 }
  0x43   :  { %245 = vrot.lane.b32.xlu1 %v244_v31, %s383_s10 }
  0x46   :  { %253 = vrot.lane.b32.xlu0 %v252_v32, %s384_s11 }
  0x7c   :  { %v14_v33 = vpop.permute.xlu0 %13  }
  0x7d   :  { %v30_v34 = vpop.permute.xlu1 %29   ;;  %261 = vst.msk [vmem:[%s655_s1 + $0x1] sm:$0x1] %vm8_vm0, %v14_v33   ;;  %262 = vst.msk [vmem:[%s655_s1 + $0x20] sm:$0x2] %vm8_vm0, %v14_v33  }
  0x7e   :  { %265 = vst.msk [vmem:[%s655_s1 + $0x3] sm:$0x1] %vm8_vm0, %v30_v34   ;;  %266 = vst.msk [vmem:[%s655_s1 + $0x22] sm:$0x2] %vm8_vm0, %v30_v34  }
  0x80   :  { %v22_v35 = vpop.permute.xlu0 %21  }
  0x81   :  { %v38_v36 = vpop.permute.xlu1 %37   ;;  %263 = vst.msk [vmem:[%s655_s1 + $0x2] sm:$0x1] %vm8_vm0, %v22_v35   ;;  %264 = vst.msk [vmem:[%s655_s1 + $0x21] sm:$0x2] %vm8_vm0, %v22_v35  }
  0x82   :  { %267 = vst.msk [vmem:[%s655_s1 + $0x4] sm:$0x1] %vm8_vm0, %v38_v36   ;;  %268 = vst.msk [vmem:[%s655_s1 + $0x23] sm:$0x2] %vm8_vm0, %v38_v36  }
  0x84   :  { %v46_v37 = vpop.permute.xlu0 %45  }
  0x85   :  { %v54_v38 = vpop.permute.xlu1 %53   ;;  %269 = vst.msk [vmem:[%s655_s1 + $0x5] sm:$0x1] %vm8_vm0, %v46_v37   ;;  %270 = vst.msk [vmem:[%s655_s1 + $0x24] sm:$0x2] %vm8_vm0, %v46_v37  }
  0x86   :  { %271 = vst.msk [vmem:[%s655_s1 + $0x6] sm:$0x1] %vm8_vm0, %v54_v38   ;;  %272 = vst.msk [vmem:[%s655_s1 + $0x25] sm:$0x2] %vm8_vm0, %v54_v38  }
  0x88   :  { %v62_v39 = vpop.permute.xlu0 %61  }
  0x89   :  { %v70_v40 = vpop.permute.xlu1 %69   ;;  %273 = vst.msk [vmem:[%s655_s1 + $0x7] sm:$0x1] %vm8_vm0, %v62_v39   ;;  %274 = vst.msk [vmem:[%s655_s1 + $0x26] sm:$0x2] %vm8_vm0, %v62_v39  }
  0x8a   :  { %275 = vst.msk [vmem:[%s655_s1 + $0x8] sm:$0x1] %vm8_vm0, %v70_v40   ;;  %276 = vst.msk [vmem:[%s655_s1 + $0x27] sm:$0x2] %vm8_vm0, %v70_v40  }
  0x8c   :  { %v78_v41 = vpop.permute.xlu0 %77  }
  0x8d   :  { %v86_v42 = vpop.permute.xlu1 %85   ;;  %277 = vst.msk [vmem:[%s655_s1 + $0x9] sm:$0x1] %vm8_vm0, %v78_v41   ;;  %278 = vst.msk [vmem:[%s655_s1 + $0x28] sm:$0x2] %vm8_vm0, %v78_v41  }
  0x8e   :  { %279 = vst.msk [vmem:[%s655_s1 + $0xa] sm:$0x1] %vm8_vm0, %v86_v42   ;;  %280 = vst.msk [vmem:[%s655_s1 + $0x29] sm:$0x2] %vm8_vm0, %v86_v42  }
  0x90   :  { %v94_v43 = vpop.permute.xlu0 %93  }
  0x91   :  { %v102_v44 = vpop.permute.xlu1 %101   ;;  %281 = vst.msk [vmem:[%s655_s1 + $0xb] sm:$0x1] %vm8_vm0, %v94_v43   ;;  %282 = vst.msk [vmem:[%s655_s1 + $0x2a] sm:$0x2] %vm8_vm0, %v94_v43  }
  0x92   :  { %283 = vst.msk [vmem:[%s655_s1 + $0xc] sm:$0x1] %vm8_vm0, %v102_v44   ;;  %284 = vst.msk [vmem:[%s655_s1 + $0x2b] sm:$0x2] %vm8_vm0, %v102_v44  }
  0x94   :  { %v110_v45 = vpop.permute.xlu0 %109  }
  0x95   :  { %v118_v46 = vpop.permute.xlu1 %117   ;;  %285 = vst.msk [vmem:[%s655_s1 + $0xd] sm:$0x1] %vm8_vm0, %v110_v45   ;;  %286 = vst.msk [vmem:[%s655_s1 + $0x2c] sm:$0x2] %vm8_vm0, %v110_v45  }
  0x96   :  { %287 = vst.msk [vmem:[%s655_s1 + $0xe] sm:$0x1] %vm8_vm0, %v118_v46   ;;  %288 = vst.msk [vmem:[%s655_s1 + $0x2d] sm:$0x2] %vm8_vm0, %v118_v46  }
  0x98   :  { %v126_v47 = vpop.permute.xlu0 %125  }
  0x99   :  { %v134_v48 = vpop.permute.xlu1 %133   ;;  %289 = vst.msk [vmem:[%s655_s1 + $0xf] sm:$0x1] %vm8_vm0, %v126_v47   ;;  %290 = vst.msk [vmem:[%s655_s1 + $0x2e] sm:$0x2] %vm8_vm0, %v126_v47  }
  0x9a   :  { %291 = vst.msk [vmem:[%s655_s1 + $0x10] sm:$0x1] %vm8_vm0, %v134_v48   ;;  %292 = vst.msk [vmem:[%s655_s1 + $0x2f] sm:$0x2] %vm8_vm0, %v134_v48  }
  0x9c   :  { %v142_v49 = vpop.permute.xlu0 %141  }
  0x9d   :  { %v150_v50 = vpop.permute.xlu1 %149   ;;  %293 = vst.msk [vmem:[%s655_s1 + $0x11] sm:$0x1] %vm8_vm0, %v142_v49   ;;  %294 = vst.msk [vmem:[%s655_s1 + $0x30] sm:$0x2] %vm8_vm0, %v142_v49  }
  0x9e   :  { %295 = vst.msk [vmem:[%s655_s1 + $0x12] sm:$0x1] %vm8_vm0, %v150_v50   ;;  %296 = vst.msk [vmem:[%s655_s1 + $0x31] sm:$0x2] %vm8_vm0, %v150_v50  }
  0xa0   :  { %v158_v51 = vpop.permute.xlu0 %157  }
  0xa1   :  { %v166_v52 = vpop.permute.xlu1 %165   ;;  %297 = vst.msk [vmem:[%s655_s1 + $0x13] sm:$0x1] %vm8_vm0, %v158_v51   ;;  %298 = vst.msk [vmem:[%s655_s1 + $0x32] sm:$0x2] %vm8_vm0, %v158_v51  }
  0xa2   :  { %299 = vst.msk [vmem:[%s655_s1 + $0x14] sm:$0x1] %vm8_vm0, %v166_v52   ;;  %300 = vst.msk [vmem:[%s655_s1 + $0x33] sm:$0x2] %vm8_vm0, %v166_v52  }
  0xa4   :  { %v174_v53 = vpop.permute.xlu0 %173  }
  0xa5   :  { %v182_v54 = vpop.permute.xlu1 %181   ;;  %301 = vst.msk [vmem:[%s655_s1 + $0x15] sm:$0x1] %vm8_vm0, %v174_v53   ;;  %302 = vst.msk [vmem:[%s655_s1 + $0x34] sm:$0x2] %vm8_vm0, %v174_v53  }
  0xa6   :  { %303 = vst.msk [vmem:[%s655_s1 + $0x16] sm:$0x1] %vm8_vm0, %v182_v54   ;;  %304 = vst.msk [vmem:[%s655_s1 + $0x35] sm:$0x2] %vm8_vm0, %v182_v54  }
  0xa8   :  { %v190_v55 = vpop.permute.xlu0 %189  }
  0xa9   :  { %v198_v56 = vpop.permute.xlu1 %197   ;;  %305 = vst.msk [vmem:[%s655_s1 + $0x17] sm:$0x1] %vm8_vm0, %v190_v55   ;;  %306 = vst.msk [vmem:[%s655_s1 + $0x36] sm:$0x2] %vm8_vm0, %v190_v55  }
  0xaa   :  { %307 = vst.msk [vmem:[%s655_s1 + $0x18] sm:$0x1] %vm8_vm0, %v198_v56   ;;  %308 = vst.msk [vmem:[%s655_s1 + $0x37] sm:$0x2] %vm8_vm0, %v198_v56  }
  0xac   :  { %v206_v57 = vpop.permute.xlu0 %205  }
  0xad   :  { %v214_v58 = vpop.permute.xlu1 %213   ;;  %309 = vst.msk [vmem:[%s655_s1 + $0x19] sm:$0x1] %vm8_vm0, %v206_v57   ;;  %310 = vst.msk [vmem:[%s655_s1 + $0x38] sm:$0x2] %vm8_vm0, %v206_v57  }
  0xae   :  { %311 = vst.msk [vmem:[%s655_s1 + $0x1a] sm:$0x1] %vm8_vm0, %v214_v58   ;;  %312 = vst.msk [vmem:[%s655_s1 + $0x39] sm:$0x2] %vm8_vm0, %v214_v58  }
  0xb0   :  { %v222_v59 = vpop.permute.xlu0 %221  }
  0xb1   :  { %v230_v60 = vpop.permute.xlu1 %229   ;;  %313 = vst.msk [vmem:[%s655_s1 + $0x1b] sm:$0x1] %vm8_vm0, %v222_v59   ;;  %314 = vst.msk [vmem:[%s655_s1 + $0x3a] sm:$0x2] %vm8_vm0, %v222_v59  }
  0xb2   :  { %315 = vst.msk [vmem:[%s655_s1 + $0x1c] sm:$0x1] %vm8_vm0, %v230_v60   ;;  %316 = vst.msk [vmem:[%s655_s1 + $0x3b] sm:$0x2] %vm8_vm0, %v230_v60  }
  0xb4   :  { %v238_v61 = vpop.permute.xlu0 %237  }
  0xb5   :  { %v246_v62 = vpop.permute.xlu1 %245   ;;  %317 = vst.msk [vmem:[%s655_s1 + $0x1d] sm:$0x1] %vm8_vm0, %v238_v61   ;;  %318 = vst.msk [vmem:[%s655_s1 + $0x3c] sm:$0x2] %vm8_vm0, %v238_v61  }
  0xb6   :  { %319 = vst.msk [vmem:[%s655_s1 + $0x1e] sm:$0x1] %vm8_vm0, %v246_v62   ;;  %320 = vst.msk [vmem:[%s655_s1 + $0x3d] sm:$0x2] %vm8_vm0, %v246_v62  }
  0xb8   :  { %v254_v63 = vpop.permute.xlu0 %253  }
  0xb9   :  { %321 = vst.msk [vmem:[%s655_s1 + $0x1f] sm:$0x1] %vm8_vm0, %v254_v63   ;;  %322 = vst.msk [vmem:[%s655_s1 + $0x3e] sm:$0x2] %vm8_vm0, %v254_v63  }

// kernel: tile.23
= control target key start
LH: loop header
LB: loop body
LE: loop exit
PB: predicated region body
PF: predicated region fallthrough
CT: control target
= control target key end

     0   :  { %s40_s0 = inlined_call_operand.vmem [shape: f32[4], index: 0, kind: input, shape index: {}]   ;;  %s41_s1 = inlined_call_operand.vmem [shape: f32[32,4], index: 1, kind: output, shape index: {}]  }
   0x1   :  { %v4_v0 = vld [vmem:[%s40_s0] ss:$0 sm:$0xff] }
   0x2   :  { %5 = vst [vmem:[%s41_s1] sm:$0xff] %v4_v0  ;;  %12 = vst [vmem:[%s41_s1 + $0x8] sm:$0xff] %v4_v0 }
   0x3   :  { %13 = vst [vmem:[%s41_s1 + $0x10] sm:$0xff] %v4_v0  ;;  %14 = vst [vmem:[%s41_s1 + $0x18] sm:$0xff] %v4_v0 }

// kernel: tile.24
= control target key start
LH: loop header
LB: loop body
LE: loop exit
PB: predicated region body
PF: predicated region fallthrough
CT: control target
= control target key end

     0   :  { %s261_s10 = smov 124   ;;  %s262_s11 = smov 116   ;;  %vm3_vm0 = vcmask 31744   ;;  %vm9_vm1 = vcmask 1048544   ;;  %vm15_vm2 = vcmask 1015744   ;;  %vm21_vm3 = vcmask 982944   ;;  %s401_s0 = inlined_call_operand.vmem [shape: f32[32,4], index: 0, kind: input, shape index: {}]   ;;  %s402_s1 = inlined_call_operand.vmem [shape: f32[1,128], index: 1, kind: output, shape index: {}]  }
   0x1   :  { %v199_v0 = vld [vmem:[%s401_s0 + $0x1f] sm:$0x1]   ;;  %v201_v1 = vld [vmem:[%s401_s0 + $0x1d] sm:$0x1]   ;;  %v200_v2 = vld [vmem:[%s401_s0 + $0x1e] sm:$0x1]  }
   0x2   :  { %7 = vrot.lane.b32.xlu0 %v199_v0, %s261_s10  ;;  %19 = vrot.lane.b32.xlu1 %v201_v1, %s262_s11  ;;  %v202_v3 = vld [vmem:[%s401_s0 + $0x1c] sm:$0x1]   ;;  %s263_s16 = smov 120   ;;  %s264_s17 = smov 112   ;;  %v203_v4 = vld [vmem:[%s401_s0 + $0x1b] sm:$0x1]  }
   0x3   :  { %v204_v5 = vld [vmem:[%s401_s0 + $0x1a] sm:$0x1]   ;;  %s265_s22 = smov 108   ;;  %s266_s23 = smov 104   ;;  %v205_v6 = vld [vmem:[%s401_s0 + $0x19] sm:$0x1]  }
   0x4   :  { %v206_v7 = vld [vmem:[%s401_s0 + $0x18] sm:$0x1]   ;;  %s267_s28 = smov 100   ;;  %s268_s29 = smov 96   ;;  %v207_v8 = vld [vmem:[%s401_s0 + $0x17] sm:$0x1]  }
   0x5   :  { %v208_v9 = vld [vmem:[%s401_s0 + $0x16] sm:$0x1]   ;;  %v2_v10 = vld [vmem:[%s401_s0] sm:$0x1]   ;;  %s269_s7 = smov 92   ;;  %s270_s8 = smov 88  }
   0x6   :  { %13 = vrot.lane.b32.xlu0 %v200_v2, %s263_s16  ;;  %25 = vrot.lane.b32.xlu1 %v202_v3, %s264_s17  ;;  %4 = vst.msk [vmem:[#allocation0] sm:$0x1] %vm3_vm0, %v2_v10   ;;  %v209_v11 = vld [vmem:[%s401_s0 + $0x15] sm:$0x1]   ;;  %v210_v12 = vld [vmem:[%s401_s0 + $0x14] sm:$0x1]  }
   0x7   :  { %s271_s13 = smov 84   ;;  %s272_s14 = smov 80   ;;  %v211_v13 = vld [vmem:[%s401_s0 + $0x13] sm:$0x1]   ;;  %v212_v14 = vld [vmem:[%s401_s0 + $0x12] sm:$0x1]  }
   0x8   :  { %s273_s19 = smov 76   ;;  %s274_s20 = smov 72   ;;  %v213_v15 = vld [vmem:[%s401_s0 + $0x11] sm:$0x1]   ;;  %v214_v16 = vld [vmem:[%s401_s0 + $0x10] sm:$0x1]  }
   0x9   :  { %s275_s25 = smov 68   ;;  %s276_s26 = smov 64   ;;  %v215_v17 = vld [vmem:[%s401_s0 + $0xf] sm:$0x1]   ;;  %v216_v18 = vld [vmem:[%s401_s0 + $0xe] sm:$0x1]  }
   0xa   :  { %31 = vrot.lane.b32.xlu0 %v203_v4, %s265_s22  ;;  %37 = vrot.lane.b32.xlu1 %v204_v5, %s266_s23  ;;  %s277_s2 = smov 60   ;;  %s278_s3 = smov 56   ;;  %v217_v19 = vld [vmem:[%s401_s0 + $0xd] sm:$0x1]   ;;  %v218_v20 = vld [vmem:[%s401_s0 + $0xc] sm:$0x1]  }
   0xb   :  { %s280_s9 = smov 48   ;;  %v219_v21 = vld [vmem:[%s401_s0 + $0xb] sm:$0x1]   ;;  %v220_v22 = vld [vmem:[%s401_s0 + $0xa] sm:$0x1]   ;;  %s282_s15 = smov 40  }
   0xc   :  { %v221_v23 = vld [vmem:[%s401_s0 + $0x9] sm:$0x1]   ;;  %v222_v24 = vld [vmem:[%s401_s0 + $0x8] sm:$0x1]   ;;  %s284_s21 = smov 32   ;;  %s286_s27 = smov 24  }
   0xd   :  { %v223_v25 = vld [vmem:[%s401_s0 + $0x7] sm:$0x1]   ;;  %v224_v26 = vld [vmem:[%s401_s0 + $0x6] sm:$0x1]   ;;  %v225_v27 = vld [vmem:[%s401_s0 + $0x5] sm:$0x1]  }
   0xe   :  { %43 = vrot.lane.b32.xlu0 %v205_v6, %s267_s28  ;;  %49 = vrot.lane.b32.xlu1 %v206_v7, %s268_s29  ;;  %v226_v28 = vld [vmem:[%s401_s0 + $0x4] sm:$0x1]   ;;  %s288_s4 = smov 16   ;;  %v227_v29 = vld [vmem:[%s401_s0 + $0x3] sm:$0x1]   ;;  %s290_s10 = smov 8  }
   0xf   :  { %v228_v30 = vld [vmem:[%s401_s0 + $0x2] sm:$0x1]   ;;  %v229_v31 = vld [vmem:[%s401_s0 + $0x1] sm:$0x1]   ;;  %s291_s0 = smov 4   ;;  %vm27_vm4 = vcmask 950144  }
  0x10   :  { %vm33_vm5 = vcmask 917344   ;;  %vm39_vm6 = vcmask 884544   ;;  %vm45_vm7 = vcmask 851744   ;;  %vm51_vm8 = vcmask 818944  }
  0x11   :  { %vm57_vm9 = vcmask 786144   ;;  %vm63_vm10 = vcmask 753344   ;;  %vm69_vm11 = vcmask 720544   ;;  %vm75_vm12 = vcmask 687744  }
  0x12   :  { %55 = vrot.lane.b32.xlu0 %v207_v8, %s269_s7  ;;  %61 = vrot.lane.b32.xlu1 %v208_v9, %s270_s8  ;;  %s279_s8 = smov 52   ;;  %vm81_vm13 = vcmask 654944   ;;  %vm87_vm14 = vcmask 622144   ;;  %vm93_vm15 = vcmask 589344   ;;  %vm99_vm0 = vcmask 556544  }
  0x16   :  { %67 = vrot.lane.b32.xlu0 %v209_v11, %s271_s13  ;;  %73 = vrot.lane.b32.xlu1 %v210_v12, %s272_s14  ;;  %s281_s14 = smov 44  }
  0x1a   :  { %79 = vrot.lane.b32.xlu0 %v211_v13, %s273_s19  ;;  %85 = vrot.lane.b32.xlu1 %v212_v14, %s274_s20  ;;  %s283_s20 = smov 36  }
  0x1e   :  { %91 = vrot.lane.b32.xlu0 %v213_v15, %s275_s25  ;;  %97 = vrot.lane.b32.xlu1 %v214_v16, %s276_s26  ;;  %s285_s26 = smov 28  }
  0x22   :  { %103 = vrot.lane.b32.xlu0 %v215_v17, %s277_s2  ;;  %109 = vrot.lane.b32.xlu1 %v216_v18, %s278_s3  ;;  %s287_s3 = smov 20  }
  0x26   :  { %115 = vrot.lane.b32.xlu0 %v217_v19, %s279_s8  ;;  %121 = vrot.lane.b32.xlu1 %v218_v20, %s280_s9  ;;  %s289_s9 = smov 12  }
  0x2a   :  { %127 = vrot.lane.b32.xlu0 %v219_v21, %s281_s14  ;;  %133 = vrot.lane.b32.xlu1 %v220_v22, %s282_s15 }
  0x2e   :  { %139 = vrot.lane.b32.xlu0 %v221_v23, %s283_s20  ;;  %145 = vrot.lane.b32.xlu1 %v222_v24, %s284_s21 }
  0x32   :  { %151 = vrot.lane.b32.xlu0 %v223_v25, %s285_s26  ;;  %157 = vrot.lane.b32.xlu1 %v224_v26, %s286_s27 }
  0x36   :  { %163 = vrot.lane.b32.xlu0 %v225_v27, %s287_s3  ;;  %169 = vrot.lane.b32.xlu1 %v226_v28, %s288_s4 }
  0x3a   :  { %175 = vrot.lane.b32.xlu0 %v227_v29, %s289_s9  ;;  %181 = vrot.lane.b32.xlu1 %v228_v30, %s290_s10 }
  0x3e   :  { %187 = vrot.lane.b32.xlu0 %v229_v31, %s291_s0 }
  0x74   :  { %v8_v32 = vpop.permute.xlu0 %7   ;;  %v20_v33 = vpop.permute.xlu1 %19  }
  0x75   :  { %10 = vst.msk [vmem:[#allocation0] sm:$0x1] %vm9_vm1, %v8_v32   ;;  %vm105_vm1 = vcmask 523744  }
  0x78   :  { %v14_v34 = vpop.permute.xlu0 %13   ;;  %v26_v35 = vpop.permute.xlu1 %25  }
  0x79   :  { %16 = vst.msk [vmem:[#allocation0] sm:$0x1] %vm15_vm2, %v14_v34   ;;  %vm111_vm2 = vcmask 490944  }
  0x7a   :  { %22 = vst.msk [vmem:[#allocation0] sm:$0x1] %vm21_vm3, %v20_v33   ;;  %vm117_vm3 = vcmask 458144  }
  0x7b   :  { %28 = vst.msk [vmem:[#allocation0] sm:$0x1] %vm27_vm4, %v26_v35   ;;  %vm123_vm4 = vcmask 425344  }
  0x7c   :  { %v32_v36 = vpop.permute.xlu0 %31   ;;  %v38_v37 = vpop.permute.xlu1 %37  }
  0x7d   :  { %34 = vst.msk [vmem:[#allocation0] sm:$0x1] %vm33_vm5, %v32_v36   ;;  %vm129_vm5 = vcmask 392544  }
  0x7e   :  { %40 = vst.msk [vmem:[#allocation0] sm:$0x1] %vm39_vm6, %v38_v37   ;;  %vm135_vm6 = vcmask 359744  }
  0x80   :  { %v44_v38 = vpop.permute.xlu0 %43   ;;  %v50_v39 = vpop.permute.xlu1 %49  }
  0x81   :  { %46 = vst.msk [vmem:[#allocation0] sm:$0x1] %vm45_vm7, %v44_v38   ;;  %vm141_vm7 = vcmask 326944  }
  0x82   :  { %52 = vst.msk [vmem:[#allocation0] sm:$0x1] %vm51_vm8, %v50_v39   ;;  %vm147_vm8 = vcmask 294144  }
  0x84   :  { %v56_v40 = vpop.permute.xlu0 %55   ;;  %v62_v41 = vpop.permute.xlu1 %61  }
  0x85   :  { %58 = vst.msk [vmem:[#allocation0] sm:$0x1] %vm57_vm9, %v56_v40   ;;  %vm153_vm9 = vcmask 261344  }
  0x86   :  { %64 = vst.msk [vmem:[#allocation0] sm:$0x1] %vm63_vm10, %v62_v41   ;;  %vm159_vm10 = vcmask 228544  }
  0x88   :  { %v68_v42 = vpop.permute.xlu0 %67   ;;  %v74_v43 = vpop.permute.xlu1 %73  }
  0x89   :  { %70 = vst.msk [vmem:[#allocation0] sm:$0x1] %vm69_vm11, %v68_v42   ;;  %vm165_vm11 = vcmask 195744  }
  0x8a   :  { %76 = vst.msk [vmem:[#allocation0] sm:$0x1] %vm75_vm12, %v74_v43   ;;  %vm171_vm12 = vcmask 162944  }
  0x8c   :  { %v80_v44 = vpop.permute.xlu0 %79   ;;  %v86_v45 = vpop.permute.xlu1 %85  }
  0x8d   :  { %82 = vst.msk [vmem:[#allocation0] sm:$0x1] %vm81_vm13, %v80_v44   ;;  %vm177_vm13 = vcmask 130144  }
  0x8e   :  { %88 = vst.msk [vmem:[#allocation0] sm:$0x1] %vm87_vm14, %v86_v45   ;;  %vm183_vm14 = vcmask 97344  }
  0x90   :  { %v92_v46 = vpop.permute.xlu0 %91   ;;  %v98_v47 = vpop.permute.xlu1 %97  }
  0x91   :  { %94 = vst.msk [vmem:[#allocation0] sm:$0x1] %vm93_vm15, %v92_v46   ;;  %vm189_vm15 = vcmask 64544  }
  0x92   :  { %100 = vst.msk [vmem:[#allocation0] sm:$0x1] %vm99_vm0, %v98_v47  }
  0x94   :  { %v104_v48 = vpop.permute.xlu0 %103   ;;  %v110_v49 = vpop.permute.xlu1 %109  }
  0x95   :  { %106 = vst.msk [vmem:[#allocation0] sm:$0x1] %vm105_vm1, %v104_v48  }
  0x96   :  { %112 = vst.msk [vmem:[#allocation0] sm:$0x1] %vm111_vm2, %v110_v49  }
  0x98   :  { %v116_v50 = vpop.permute.xlu0 %115   ;;  %v122_v51 = vpop.permute.xlu1 %121  }
  0x99   :  { %118 = vst.msk [vmem:[#allocation0] sm:$0x1] %vm117_vm3, %v116_v50  }
  0x9a   :  { %124 = vst.msk [vmem:[#allocation0] sm:$0x1] %vm123_vm4, %v122_v51  }
  0x9c   :  { %v128_v52 = vpop.permute.xlu0 %127   ;;  %v134_v53 = vpop.permute.xlu1 %133  }
  0x9d   :  { %130 = vst.msk [vmem:[#allocation0] sm:$0x1] %vm129_vm5, %v128_v52  }
  0x9e   :  { %136 = vst.msk [vmem:[#allocation0] sm:$0x1] %vm135_vm6, %v134_v53  }
  0xa0   :  { %v140_v54 = vpop.permute.xlu0 %139   ;;  %v146_v55 = vpop.permute.xlu1 %145  }
  0xa1   :  { %142 = vst.msk [vmem:[#allocation0] sm:$0x1] %vm141_vm7, %v140_v54  }
  0xa2   :  { %148 = vst.msk [vmem:[#allocation0] sm:$0x1] %vm147_vm8, %v146_v55  }
  0xa4   :  { %v152_v56 = vpop.permute.xlu0 %151   ;;  %v158_v57 = vpop.permute.xlu1 %157  }
  0xa5   :  { %154 = vst.msk [vmem:[#allocation0] sm:$0x1] %vm153_vm9, %v152_v56  }
  0xa6   :  { %160 = vst.msk [vmem:[#allocation0] sm:$0x1] %vm159_vm10, %v158_v57  }
  0xa8   :  { %v164_v58 = vpop.permute.xlu0 %163   ;;  %v170_v59 = vpop.permute.xlu1 %169  }
  0xa9   :  { %166 = vst.msk [vmem:[#allocation0] sm:$0x1] %vm165_vm11, %v164_v58  }
  0xaa   :  { %172 = vst.msk [vmem:[#allocation0] sm:$0x1] %vm171_vm12, %v170_v59  }
  0xac   :  { %v176_v60 = vpop.permute.xlu0 %175   ;;  %v182_v61 = vpop.permute.xlu1 %181  }
  0xad   :  { %178 = vst.msk [vmem:[#allocation0] sm:$0x1] %vm177_vm13, %v176_v60  }
  0xae   :  { %184 = vst.msk [vmem:[#allocation0] sm:$0x1] %vm183_vm14, %v182_v61  }
  0xb0   :  { %v188_v62 = vpop.permute.xlu0 %187  }
  0xb1   :  { %190 = vst.msk [vmem:[#allocation0] sm:$0x1] %vm189_vm15, %v188_v62  }
  0xb8   :  { %v195_v63 = vld [vmem:[#allocation0] sm:$0x1] }
  0xb9   :  { %198 = vst [vmem:[%s402_s1] sm:$0x1] %v195_v63 }

// kernel: upblock_forward.4
= control target key start
LH: loop header
LB: loop body
LE: loop exit
PB: predicated region body
PF: predicated region fallthrough
CT: control target
= control target key end

     0   :  { %s1067_s18 = smov 0   ;;  %s1268_s0 = inlined_call_operand.vmem [shape: f32[2,32,128], index: 0, kind: input, shape index: {}]   ;;  %s1269_s1 = inlined_call_operand.vmem [shape: f32[1,128], index: 1, kind: input, shape index: {}]   ;;  %s1270_s2 = inlined_call_operand.vmem [shape: f32[1,128], index: 2, kind: input, shape index: {}]   ;;  %s1271_s3 = inlined_call_operand.vmem [shape: bf16[3,136,128], index: 3, kind: input, shape index: {}]   ;;  %s1272_s4 = inlined_call_operand.vmem [shape: f32[2,32,128], index: 4, kind: output, shape index: {0}]   ;;  %s1273_s5 = inlined_call_operand.vmem [shape: f32[2,2,128], index: 5, kind: output, shape index: {1}]  }
   0x1 LB: > { %s889_s19 = sadd.s32 4294967295, %s1033_s18   ;;  %p893_p0 = scmp.ge.s32.totalorder %s1033_s18, 1  ;;  %s1033_s18 = sphi %s1067_s18, %s16_s18  }
   0x2   : > { %p190_p1 = scmp.lt.s32.totalorder %s1033_s18, 3 }
   0x4   : > { %p191_p2 = pnand %p893_p0, %p190_p1 }
   0x5   : > { %p222_p3 = scmp.lt.s32.totalorder (!%p191_p2), %s889_s19, 1 }
   0x6   : > { %194 = sbr.rel (%p191_p2) target bundleno = 305 (0x131), region = 36 }
   0xb   : > { %v1000_v0 = vld [vmem:[%s1271_s3 + $0x7c] sm:$0xff]   ;;  %v1035_v1 = vmov 0   ;;  %v1002_v3 = vld [vmem:[%s1271_s3 + $0x74] sm:$0xff]   ;;  %vm238_vm0 = vcmask 64512   ;;  %v1036_v5 = vmov 0.0   ;;  %v1004_v6 = vld [vmem:[%s1271_s3 + $0x6c] sm:$0xff]  }
   0xc   : > { %460 = vmatprep.subr.bf16.mxu0 %v1035_v1  ;;  %568 = vmatprep.subr.bf16.mxu1 %v1035_v1  ;;  %v1001_v2 = vld [vmem:[%s1271_s3 + $0x38] sm:$0xff]   ;;  %v1003_v4 = vld [vmem:[%s1271_s3 + $0x30] sm:$0xff]   ;;  %237 = vst [vmem:[#allocation2] sm:$0xff] %v1036_v5  ;;  %246 = vst [vmem:[#allocation2 + $0x40] sm:$0x3] %v1036_v5  ;;  %vm247_vm1 = vcmask 58368  }
   0xd   : > { %461 = vmatpush1.bf16.msra.mxu0 %v1000_v0  ;;  %569 = vmatpush1.bf16.msra.mxu1 %v1001_v2  ;;  %239 = vst.msk [vmem:[#allocation2 + $0x8] sm:$0xff] %vm238_vm0, %v1036_v5  ;;  %241 = vst.msk [vmem:[#allocation2 + $0x18] sm:$0xff] %vm238_vm0, %v1036_v5  ;;  %v1005_v7 = vld [vmem:[%s1271_s3 + $0x28] sm:$0xff]   ;;  %s1275_s19 = smov (!%p222_p3, %s889_s19), 1  ;;  %v1007_v9 = vld [vmem:[%s1271_s3 + $0x20] sm:$0xff]   ;;  %vm456_vm2 = vcmask 1043456  }
   0xe   : > { %462 = vmatprep.subr.bf16.mxu0 %v1035_v1  ;;  %570 = vmatprep.subr.bf16.mxu1 %v1035_v1  ;;  %243 = vst.msk [vmem:[#allocation2 + $0x28] sm:$0xff] %vm238_vm0, %v1036_v5  ;;  %245 = vst.msk [vmem:[#allocation2 + $0x38] sm:$0xff] %vm238_vm0, %v1036_v5  ;;  %v1006_v8 = vld [vmem:[%s1271_s3 + $0x64] sm:$0xff]   ;;  %s970_s11 = sshll.u32 %s1275_s19, 5  ;;  %v1008_v10 = vld [vmem:[%s1271_s3 + $0x5c] sm:$0xff]   ;;  %vm283_vm4 = vcmask 1040384  }
   0xf   : > { %248 = vst.msk [vmem:[#allocation2 + $0x48] sm:$0x3] %vm247_vm1, %v1036_v5  ;;  %v1009_v11 = vld [vmem:[%s1271_s3 + $0x18] sm:$0xff]   ;;  %s226_s22 = scalar_lea.vmem %s1268_s0, %s970_s11  ;;  %v1011_v13 = vld [vmem:[%s1271_s3 + $0x10] sm:$0xff]   ;;  %v899_v26 = vld [vmem:[%s1269_s1] ss:$0 sm:$0xff]  ;;  %s231_s15 = scalar_lea.vmem %s1272_s4, %s970_s11 }
  0x10   : > { %v1010_v12 = vld [vmem:[%s1271_s3 + $0x54] sm:$0xff]   ;;  %v249_v22 = vld [vmem:[%s226_s22] sm:$0xff]  ;;  %v250_v23 = vld [vmem:[%s226_s22 + $0x8] sm:$0xff]  ;;  %vm356_vm3 = vsmask.f32 7424  ;;  %vm649_vm5 = vcmask 1046528  }
  0x11   : > { %463 = vmatpush1.bf16.msra.mxu0 %v1002_v3  ;;  %571 = vmatpush1.bf16.msra.mxu1 %v1003_v4  ;;  %v251_v24 = vld [vmem:[%s226_s22 + $0x10] sm:$0xff]  ;;  %v252_v25 = vld [vmem:[%s226_s22 + $0x18] sm:$0xff]  ;;  %v900_v27 = vld [vmem:[%s1270_s2] ss:$0 sm:$0xff]  ;;  %v260_v33 = vmul.f32 %v899_v26, %v249_v22  ;;  %v261_v34 = vmul.f32 %v899_v26, %v250_v23  ;;  %s898_s11 = sshll.u32 %s1275_s19, 1 }
  0x12   : > { %464 = vmatprep.subr.bf16.mxu0 %v1035_v1  ;;  %572 = vmatprep.subr.bf16.mxu1 %v1035_v1  ;;  %v1012_v28 = vld [vmem:[%s1271_s3 + $0x4c] sm:$0xff]   ;;  %v262_v35 = vmul.f32 %v899_v26, %v251_v24  ;;  %v263_v36 = vmul.f32 %v899_v26, %v252_v25  ;;  %v1014_v39 = vld [vmem:[%s1271_s3 + $0x44] sm:$0xff]   ;;  %v1017_v51 = vld [vmem:[%s1271_s3 + $0x40] ss:$0 sps:$4 sm:$0xff]   ;;  %s235_s20 = scalar_lea.vmem %s1273_s5, %s898_s11 }
  0x13   : > { %v1013_v32 = vld [vmem:[%s1271_s3 + $0x8] sm:$0xff]   ;;  %v271_v40 = vadd.f32 %v900_v27, %v260_v33  ;;  %v272_v41 = vadd.f32 %v900_v27, %v261_v34  ;;  %v1015_v44 = vld [vmem:[%s1271_s3] sm:$0xff]   ;;  %v566_v62 = vsel %vm456_vm2, %v1017_v51, 0 }
  0x14   : > { %v1137_v14 = vld [vmem:[#allocation2 + $0x18] sm:$0xff]  ;;  %v331_v17 = vld [vmem:[#allocation2 + $0x8] sm:$0xfe]  ;;  %v273_v42 = vadd.f32 %v900_v27, %v262_v35  ;;  %v274_v43 = vadd.f32 %v900_v27, %v263_v36  ;;  %v1016_v50 = vld [vmem:[%s1271_s3 + $0x84] ss:$0 sps:$4 sm:$0xff]  }
  0x15   : > { %465 = vmatpush1.bf16.msra.mxu0 %v1004_v6  ;;  %573 = vmatpush1.bf16.msra.mxu1 %v1005_v7  ;;  %v306_v15 = vld [vmem:[#allocation2 + $0x28] sm:$0xff]  ;;  %v308_v16 = vld [vmem:[#allocation2 + $0x38] sm:$0xff]  ;;  %v335_v20 = vpack.c.bf16 %v1137_v14, %v331_v17  ;;  %v275_v46 = vmax.f32 %v271_v40, 0.0  ;;  %v276_v47 = vmax.f32 %v272_v41, 0.0  ;;  %v458_v61 = vsel %vm456_vm2, %v1016_v50, 0  ;;  %v1018_v3 = vld [vmem:[%s1271_s3 + $0xc0] sm:$0xff]  }
  0x16   : > { %466 = vmatprep.subr.bf16.mxu0 %v1035_v1  ;;  %574 = vmatprep.subr.bf16.mxu1 %v1035_v1  ;;  %v302_v18 = vld [vmem:[#allocation2 + $0x8] sm:$0xff]  ;;  %v1140_v19 = vpack.c.bf16 %v308_v16, %v306_v15  ;;  %v277_v48 = vmax.f32 %v273_v42, 0.0  ;;  %v278_v49 = vmax.f32 %v274_v43, 0.0  ;;  %v1024_v40 = vld [vmem:[%s1271_s3 + $0x90] sm:$0xff]  }
  0x17   : > { %v310_v21 = vpack.c.bf16 %v1137_v14, %v302_v18  ;;  %v370_v29 = vshrl.u32 %v335_v20, 16  ;;  %v372_v30 = vshll.u32 %v335_v20, 16  ;;  %v284_v53 = vrot.slane %v275_v46, 7  ;;  %v333_v60 = vld [vmem:[#allocation2 + $0x48] sm:$0x1]  ;;  %v1019_v18 = vld [vmem:[%s1271_s3 + $0xb8] sm:$0xff]  }
  0x18   : > { %v377_v31 = vshll.u32 %v1140_v19, 16  ;;  %v285_v54 = vrot.slane %v276_v47, 7  ;;  %v287_v55 = vrot.slane %v277_v48, 7  ;;  %v289_v56 = vrot.slane %v278_v49, 7  ;;  %v620_v4 = vld [vmem:[#allocation2 + $0x48] sm:$0x3] }
  0x19   : > { %467 = vmatpush1.bf16.msra.mxu0 %v1006_v8  ;;  %575 = vmatpush1.bf16.msra.mxu1 %v1007_v9  ;;  %v374_v37 = vrot.slane %v372_v30, 1  ;;  %296 = vst [vmem:[#allocation2] sm:$0xfe] %v284_v53  ;;  %v337_v63 = vpack.c.bf16 %v333_v60, %v333_v60  ;;  %v389_v2 = vshrl.u32 %v1140_v19, 16  ;;  %v624_v16 = vpack.c.bf16 %v620_v4, %v620_v4  ;;  %v618_v23 = vld [vmem:[#allocation2 + $0x8] sm:$0xfc] }
  0x1a   : > { %468 = vmatprep.subr.bf16.mxu0 %v1035_v1  ;;  %576 = vmatprep.subr.bf16.mxu1 %v1035_v1  ;;  %v379_v38 = vrot.slane %v377_v31, 1  ;;  %v1178_v57 = vsel %vm283_vm4, %v284_v53, %v285_v54  ;;  %v288_v58 = vsel %vm283_vm4, %v285_v54, %v287_v55  ;;  %v290_v59 = vsel %vm283_vm4, %v287_v55, %v289_v56  ;;  %v1025_v42 = vld [vmem:[%s1271_s3 + $0x88] sm:$0xff]  }
  0x1b   : > { %938 = vmatprep.mubr.msk.bf16.mxu1 %vm238_vm0, %v310_v21  ;;  %v375_v45 = vor.u32 %v374_v37, %v370_v29  ;;  %300 = vst [vmem:[#allocation2 + $0x40] sm:$0x1] %v289_v56  ;;  %v1186_v0 = vpack.c.bf16 %v290_v59, %v288_v58  ;;  %v393_v7 = vshll.u32 %v337_v63, 16  ;;  %v654_v24 = vrot.slane %v1140_v19, 1  ;;  %v1020_v29 = vld [vmem:[%s1271_s3 + $0xb0] sm:$0xff]   ;;  %v1022_v37 = vld [vmem:[%s1271_s3 + $0xa0] sm:$0xff]  }
  0x1c   : > { %v391_v17 = vor.u32 %v389_v2, %v379_v38  ;;  %v622_v31 = vpack.c.bf16 %v1137_v14, %v618_v23  ;;  %v1021_v14 = vld [vmem:[%s1271_s3 + $0xa8] sm:$0xff]  }
  0x1d   : > { %469 = vmatpush1.bf16.msra.mxu0 %v1008_v10  ;;  %577 = vmatpush1.bf16.msra.mxu1 %v1009_v11  ;;  %v380_v52 = vsel %vm356_vm3, %v375_v45, %v379_v38  ;;  %v365_v10 = vshll.u32 %v1186_v0, 16  ;;  %v395_v20 = vrot.slane %v393_v7, 1  ;;  %v381_v26 = vshrl.u32 %v1186_v0, 16 }
  0x1e   : > { %470 = vmatprep.subr.bf16.mxu0 %v1035_v1  ;;  %578 = vmatprep.subr.bf16.mxu1 %v1035_v1  ;;  %v653_v35 = vrot.slane %v622_v31, 1  ;;  %v651_v46 = vrot.slane %v1186_v0, 1 }
  0x1f   : > { %927 = vmatprep.mubr.msk.bf16.mxu0 %vm238_vm0, %v380_v52  ;;  %v367_v22 = vrot.slane %v365_v10, 1  ;;  %v396_v30 = vsel %vm356_vm3, %v391_v17, %v395_v20 }
  0x20   : > { %v330_v5 = vld [vmem:[#allocation2] sm:$0xfe]  ;;  %v655_v38 = vsel %vm649_vm5, %v653_v35, %v654_v24 }
  0x21   : > { %471 = vmatpush1.bf16.msra.mxu0 %v1010_v12  ;;  %579 = vmatpush1.bf16.msra.mxu1 %v1011_v13  ;;  %v301_v6 = vld [vmem:[#allocation2] sm:$0xff]  ;;  %v334_v9 = vpack.c.bf16 %v1178_v57, %v330_v5 }
  0x22   : > { %472 = vmatprep.subr.bf16.mxu0 %v1035_v1  ;;  %580 = vmatprep.subr.bf16.mxu1 %v1035_v1  ;;  %v332_v8 = vld [vmem:[#allocation2 + $0x40] sm:$0x1]  ;;  %v309_v11 = vpack.c.bf16 %v1178_v57, %v301_v6  ;;  %v617_v45 = vld [vmem:[#allocation2] sm:$0xfc] }
  0x23   : > { %v358_v12 = vshrl.u32 %v334_v9, 16  ;;  %v360_v13 = vshll.u32 %v334_v9, 16  ;;  %v336_v15 = vpack.c.bf16 %v332_v8, %v332_v8  ;;  %v619_v41 = vld [vmem:[#allocation2 + $0x40] sm:$0x3]  ;;  %v621_v49 = vpack.c.bf16 %v1178_v57, %v617_v45 }
  0x24   : > { %v623_v43 = vpack.c.bf16 %v619_v41, %v619_v41 }
  0x25   : > { %473 = vmatpush1.bf16.msra.mxu0 %v1012_v28  ;;  %581 = vmatpush1.bf16.msra.mxu1 %v1013_v32  ;;  %v362_v21 = vrot.slane %v360_v13, 1  ;;  %v385_v27 = vshll.u32 %v336_v15, 16  ;;  %v658_v28 = vrot.slane %v624_v16, 1  ;;  %v650_v51 = vrot.slane %v621_v49, 1 }
  0x26   : > { %474 = vmatprep.subr.bf16.mxu0 %v1035_v1  ;;  %582 = vmatprep.subr.bf16.mxu1 %v1035_v1  ;;  %v656_v47 = vrot.slane %v623_v43, 1 }
  0x27   : > { %v363_v25 = vor.u32 %v362_v21, %v358_v12  ;;  %v387_v33 = vrot.slane %v385_v27, 1  ;;  %v659_v34 = vsel %vm649_vm5, %v654_v24, %v658_v28  ;;  %v652_v52 = vsel %vm649_vm5, %v650_v51, %v651_v46 }
  0x28   : > { %v657_v50 = vsel %vm649_vm5, %v651_v46, %v656_v47 }
  0x29   : > { %475 = vmatpush1.bf16.msra.mxu0 %v1014_v39  ;;  %583 = vmatpush1.bf16.msra.mxu1 %v1015_v44  ;;  %v368_v32 = vsel %vm356_vm3, %v363_v25, %v367_v22  ;;  %v1023_v39 = vld [vmem:[%s1271_s3 + $0x98] sm:$0xff]   ;;  %v1026_v44 = vld [vmem:[%s1271_s3 + $0xc8] ss:$0 sps:$4 sm:$0xff]  }
  0x2a   : > { %490 = vmatprep.subr.bf16.mxu0 %v1035_v1  ;;  %598 = vmatprep.subr.bf16.mxu1 %v1035_v1  ;;  %v720_v48 = vsel %vm456_vm2, %v1026_v44, 0 }
  0x2d   : > { %491 = vmatpush2.bf16.msra.mxu0 %v458_v61  ;;  %599 = vmatpush2.bf16.msra.mxu1 %v566_v62 }
  0x2e   : > { %722 = vmatprep.subr.bf16.mxu0 %v1035_v1  ;;  %972 = vmatprep.subr.bf16.mxu1 %v1035_v1 }
  0x30   : > { %601 = vmatmul.mubr.bf16.vlgmr.msra.gmra.mxu1 %v309_v11  ;;  %493 = vmatmul.mubr.bf16.vlgmr.msra.gmra.mxu0 %v368_v32 }
  0x31   : > { %981 = vmatpush1.bf16.msra.mxu1 %v1018_v3  ;;  %939 = vmatprep.mubr.msk.bf16.mxu1 %vm238_vm0, %v1140_v19  ;;  %v383_v19 = vor.u32 %v381_v26, %v367_v22 }
  0x32   : > { %973 = vmatprep.subr.bf16.mxu1 %v1035_v1  ;;  %723 = vmatpush1.bf16.msra.mxu0 %v1018_v3 }
  0x33   : > { %928 = vmatprep.mubr.msk.bf16.mxu0 %vm238_vm0, %v396_v30  ;;  %724 = vmatprep.subr.bf16.mxu0 %v1035_v1  ;;  %v388_v36 = vsel %vm356_vm3, %v383_v19, %v387_v33 }
  0x35   : > { %982 = vmatpush1.bf16.msra.mxu1 %v1019_v18 }
  0x36   : > { %974 = vmatprep.subr.bf16.mxu1 %v1035_v1  ;;  %725 = vmatpush1.bf16.msra.mxu0 %v1019_v18 }
  0x37   : > { %726 = vmatprep.subr.bf16.mxu0 %v1035_v1 }
  0x38   : > { %609 = vmatmul.mubr.bf16.gmra.mxu1 %v1186_v0  ;;  %501 = vmatmul.mubr.bf16.gmra.mxu0 %v388_v36 }
  0x39   : > { %983 = vmatpush1.bf16.msra.mxu1 %v1020_v29  ;;  %967 = vmatprep.mubr.msk.bf16.mxu1 %vm238_vm0, %v659_v34 }
  0x3a   : > { %975 = vmatprep.subr.bf16.mxu1 %v1035_v1  ;;  %727 = vmatpush1.bf16.msra.mxu0 %v1020_v29 }
  0x3b   : > { %966 = vmatprep.mubr.msk.bf16.mxu0 %vm238_vm0, %v655_v38  ;;  %728 = vmatprep.subr.bf16.mxu0 %v1035_v1 }
  0x3d   : > { %984 = vmatpush1.bf16.msra.mxu1 %v1021_v14 }
  0x3e   : > { %976 = vmatprep.subr.bf16.mxu1 %v1035_v1  ;;  %729 = vmatpush1.bf16.msra.mxu0 %v1021_v14 }
  0x3f   : > { %730 = vmatprep.subr.bf16.mxu0 %v1035_v1 }
  0x41   : > { %985 = vmatpush1.bf16.msra.mxu1 %v1022_v37 }
  0x42   : > { %977 = vmatprep.subr.bf16.mxu1 %v1035_v1  ;;  %731 = vmatpush1.bf16.msra.mxu0 %v1022_v37 }
  0x43   : > { %732 = vmatprep.subr.bf16.mxu0 %v1035_v1 }
  0x45   : > { %986 = vmatpush1.bf16.msra.mxu1 %v1023_v39 }
  0x46   : > { %978 = vmatprep.subr.bf16.mxu1 %v1035_v1  ;;  %733 = vmatpush1.bf16.msra.mxu0 %v1023_v39 }
  0x47   : > { %734 = vmatprep.subr.bf16.mxu0 %v1035_v1 }
  0x49   : > { %987 = vmatpush1.bf16.msra.mxu1 %v1024_v40 }
  0x4a   : > { %979 = vmatprep.subr.bf16.mxu1 %v1035_v1  ;;  %735 = vmatpush1.bf16.msra.mxu0 %v1024_v40 }
  0x4b   : > { %736 = vmatprep.subr.bf16.mxu0 %v1035_v1 }
  0x4d   : > { %988 = vmatpush1.bf16.msra.mxu1 %v1025_v42 }
  0x4e   : > { %980 = vmatprep.subr.bf16.mxu1 %v1035_v1  ;;  %737 = vmatpush1.bf16.msra.mxu0 %v1025_v42 }
  0x4f   : > { %752 = vmatprep.subr.bf16.mxu0 %v1035_v1 }
  0x51   : > { %989 = vmatpush2.bf16.msra.mxu1 %v720_v48 }
  0x52   : > { %753 = vmatpush2.bf16.msra.mxu0 %v720_v48 }
  0x54   : > { %763 = vmatmul.mubr.bf16.vlgmr.msra.gmra.mxu1 %v657_v50 }
  0x55   : > { %755 = vmatmul.mubr.bf16.vlgmr.msra.gmra.mxu0 %v652_v52 }
  0xf0   : > { %v602_v53 = vpop.f32.mrf.mxu1  ;;  %v494_v57 = vpop.f32.mrf.mxu0 }
  0xf1   : > { %v603_v12 = vadd.f32 %v602_v53, %v494_v57 }
  0xf2   : > { %v604_v54 = vpop.f32.mrf.mxu1  ;;  %v496_v58 = vpop.f32.mrf.mxu0 }
  0xf4   : > { %v605_v55 = vpop.f32.mrf.mxu1  ;;  %v497_v60 = vpop.f32.mrf.mxu0 }
  0xf5   : > { %v606_v18 = vadd.f32 %v605_v55, %v497_v60 }
  0xf6   : > { %v607_v56 = vpop.f32.mrf.mxu1  ;;  %v499_v62 = vpop.f32.mrf.mxu0 }
  0xf8   : > { %v610_v59 = vpop.f32.mrf.mxu1  ;;  %v502_v0 = vpop.f32.mrf.mxu0 }
  0xf9   : > { %v611_v5 = vadd.f32 %v610_v59, %v502_v0 }
  0xfa   : > { %v612_v61 = vpop.f32.mrf.mxu1  ;;  %v504_v3 = vpop.f32.mrf.mxu0 }
  0xfc   : > { %v613_v63 = vpop.f32.mrf.mxu1  ;;  %v505_v1 = vpop.f32.mrf.mxu0 }
  0xfd   : > { %v614_v9 = vadd.f32 %v613_v63, %v505_v1 }
  0xfe   : > { %v615_v2 = vpop.f32.mrf.mxu1  ;;  %v507_v4 = vpop.f32.mrf.mxu0 }
 0x114   : > { %v764_v6 = vpop.f32.mrf.mxu1 }
 0x115   : > { %v773_v7 = vadd.f32 %v764_v6, %v611_v5  ;;  %v756_v15 = vpop.f32.mrf.mxu0 }
 0x116   : > { %v766_v8 = vpop.f32.mrf.mxu1  ;;  %v771_v16 = vadd.f32 %v756_v15, %v603_v12 }
 0x117   : > { %777 = vst [vmem:[%s231_s15 + $0x10] sm:$0xff] %v773_v7  ;;  %v758_v17 = vpop.f32.mrf.mxu0  ;;  %v791_v26 = vmul.f32 %v773_v7, %v773_v7 }
 0x118   : > { %v767_v10 = vpop.f32.mrf.mxu1  ;;  %775 = vst [vmem:[%s231_s15] sm:$0xff] %v771_v16  ;;  %v789_v23 = vmul.f32 %v771_v16, %v771_v16 }
 0x119   : > { %v774_v11 = vadd.f32 %v767_v10, %v614_v9  ;;  %v759_v20 = vpop.f32.mrf.mxu0 }
 0x11a   : > { %v769_v13 = vpop.f32.mrf.mxu1  ;;  %v772_v21 = vadd.f32 %v759_v20, %v606_v18 }
 0x11b   : > { %778 = vst [vmem:[%s231_s15 + $0x18] sm:$0xff] %v774_v11  ;;  %v761_v22 = vpop.f32.mrf.mxu0  ;;  %v792_v30 = vmul.f32 %v774_v11, %v774_v11 }
 0x11c   : > { %776 = vst [vmem:[%s231_s15 + $0x8] sm:$0xff] %v772_v21  ;;  %v779_v24 = vadd.f32 %v772_v21, %v771_v16  ;;  %v790_v25 = vmul.f32 %v772_v21, %v772_v21 }
 0x11e   : > { %v793_v27 = vadd.f32 %v790_v25, %v789_v23  ;;  %v780_v28 = vadd.f32 %v779_v24, %v773_v7 }
 0x120   : > { %v781_v29 = vadd.f32 %v780_v28, %v774_v11  ;;  %v794_v31 = vadd.f32 %v793_v27, %v791_v26 }
 0x122   : > { %v782_v32 = vrot.slane %v781_v29, 4  ;;  %v795_v19 = vadd.f32 %v794_v31, %v792_v30 }
 0x124   : > { %v783_v33 = vadd.f32 %v782_v32, %v781_v29  ;;  %v796_v34 = vrot.slane %v795_v19, 4 }
 0x126   : > { %v784_v14 = vrot.slane %v783_v33, 2  ;;  %v797_v35 = vadd.f32 %v796_v34, %v795_v19 }
 0x128   : > { %v785_v36 = vadd.f32 %v784_v14, %v783_v33  ;;  %v798_v37 = vrot.slane %v797_v35, 2 }
 0x12a   : > { %v786_v38 = vrot.slane %v785_v36, 1  ;;  %v799_v39 = vadd.f32 %v798_v37, %v797_v35 }
 0x12c   : > { %v787_v40 = vadd.f32 %v786_v38, %v785_v36  ;;  %v800_v41 = vrot.slane %v799_v39, 1 }
 0x12e   : > { %788 = vst [vmem:[%s235_s20] sm:$0x1] %v787_v40  ;;  %v801_v42 = vadd.f32 %v800_v41, %v799_v39 }
 0x130   : > { %802 = vst [vmem:[%s235_s20 + $0x1] sm:$0x1] %v801_v42 }
 0x131 PF: > { %s16_s18 = sadd.s32 1, %s1033_s18  }
 0x132   : > { %p13_p4 = scmp.ge.s32.totalorder %s16_s18, 4  }
 0x134   :  { %15 = sbr.rel (!%p13_p4) target bundleno = 1 (0x1), region = 80 }

// kernel: squeeze.6
= control target key start
LH: loop header
LB: loop body
LE: loop exit
PB: predicated region body
PF: predicated region fallthrough
CT: control target
= control target key end

     0   :  { %s259_s8 = smov 116   ;;  %s260_s9 = smov 120   ;;  %vm8_vm0 = vcmask 31744   ;;  %s430_s0 = inlined_call_operand.vmem [shape: f32[128], index: 0, kind: input, shape index: {}]   ;;  %s431_s1 = inlined_call_operand.vmem [shape: f32[32,4], index: 1, kind: output, shape index: {}]  }
   0x1   :  { %v5_v0 = vld [vmem:[%s430_s0] sm:$0x1]  ;;  %s258_s0 = smov 124   ;;  %s261_s10 = smov 112  }
   0x2   :  { %6 = vst [vmem:[#allocation0] sm:$0x1] %v5_v0  ;;  %s262_s11 = smov 108   ;;  %s263_s12 = smov 104  }
   0x3   :  { %s264_s13 = smov 100   ;;  %s265_s14 = smov 96  }
   0x4   :  { %s266_s15 = smov 92   ;;  %s267_s16 = smov 88  }
   0x5   :  { %s268_s17 = smov 84   ;;  %s269_s18 = smov 80  }
   0x6   :  { %s270_s19 = smov 76   ;;  %s271_s20 = smov 72  }
   0x7   :  { %s272_s21 = smov 68   ;;  %s273_s22 = smov 64  }
   0x8   :  { %s274_s23 = smov 60   ;;  %s275_s24 = smov 56  }
   0x9   :  { %v10_v1 = vld [vmem:[#allocation0] sm:$0x1]   ;;  %s276_s25 = smov 52   ;;  %s277_s26 = smov 48  }
   0xa   :  { %v22_v2 = vld [vmem:[#allocation0] sm:$0x1]   ;;  %11 = vrot.lane.b32.xlu0 %v10_v1, %s258_s0  ;;  %s278_s27 = smov 44   ;;  %s279_s28 = smov 40  }
   0xb   :  { %23 = vrot.lane.b32.xlu1 %v22_v2, %s259_s8  ;;  %v16_v3 = vld [vmem:[#allocation0] sm:$0x1]   ;;  %s280_s29 = smov 36   ;;  %s281_s30 = smov 32  }
   0xc   :  { %v28_v4 = vld [vmem:[#allocation0] sm:$0x1]   ;;  %s282_s4 = smov 28   ;;  %s283_s5 = smov 24  }
   0xd   :  { %v34_v5 = vld [vmem:[#allocation0] sm:$0x1]   ;;  %s284_s6 = smov 20   ;;  %s285_s7 = smov 16  }
   0xe   :  { %17 = vrot.lane.b32.xlu0 %v16_v3, %s260_s9  ;;  %v40_v6 = vld [vmem:[#allocation0] sm:$0x1]   ;;  %s286_s0 = smov 12   ;;  %s287_s8 = smov 8  }
   0xf   :  { %29 = vrot.lane.b32.xlu1 %v28_v4, %s261_s10  ;;  %v46_v7 = vld [vmem:[#allocation0] sm:$0x1]   ;;  %s288_s9 = smov 4  }
  0x10   :  { %v52_v8 = vld [vmem:[#allocation0] sm:$0x1]  }
  0x11   :  { %v58_v9 = vld [vmem:[#allocation0] sm:$0x1]  }
  0x12   :  { %35 = vrot.lane.b32.xlu0 %v34_v5, %s262_s11  ;;  %v64_v10 = vld [vmem:[#allocation0] sm:$0x1]  }
  0x13   :  { %41 = vrot.lane.b32.xlu1 %v40_v6, %s263_s12  ;;  %v70_v11 = vld [vmem:[#allocation0] sm:$0x1]  }
  0x14   :  { %v76_v12 = vld [vmem:[#allocation0] sm:$0x1]  }
  0x15   :  { %v82_v13 = vld [vmem:[#allocation0] sm:$0x1]  }
  0x16   :  { %47 = vrot.lane.b32.xlu0 %v46_v7, %s264_s13  ;;  %v88_v14 = vld [vmem:[#allocation0] sm:$0x1]  }
  0x17   :  { %53 = vrot.lane.b32.xlu1 %v52_v8, %s265_s14  ;;  %v94_v15 = vld [vmem:[#allocation0] sm:$0x1]  }
  0x18   :  { %v100_v16 = vld [vmem:[#allocation0] sm:$0x1]  }
  0x19   :  { %v106_v17 = vld [vmem:[#allocation0] sm:$0x1]  }
  0x1a   :  { %59 = vrot.lane.b32.xlu0 %v58_v9, %s266_s15  ;;  %v112_v18 = vld [vmem:[#allocation0] sm:$0x1]  }
  0x1b   :  { %65 = vrot.lane.b32.xlu1 %v64_v10, %s267_s16  ;;  %v118_v19 = vld [vmem:[#allocation0] sm:$0x1]  }
  0x1c   :  { %v124_v20 = vld [vmem:[#allocation0] sm:$0x1]  }
  0x1d   :  { %v130_v21 = vld [vmem:[#allocation0] sm:$0x1]  }
  0x1e   :  { %71 = vrot.lane.b32.xlu0 %v70_v11, %s268_s17  ;;  %v136_v22 = vld [vmem:[#allocation0] sm:$0x1]  }
  0x1f   :  { %77 = vrot.lane.b32.xlu1 %v76_v12, %s269_s18  ;;  %v142_v23 = vld [vmem:[#allocation0] sm:$0x1]  }
  0x20   :  { %v148_v24 = vld [vmem:[#allocation0] sm:$0x1]  }
  0x21   :  { %v154_v25 = vld [vmem:[#allocation0] sm:$0x1]  }
  0x22   :  { %83 = vrot.lane.b32.xlu0 %v82_v13, %s270_s19  ;;  %v160_v26 = vld [vmem:[#allocation0] sm:$0x1]  }
  0x23   :  { %89 = vrot.lane.b32.xlu1 %v88_v14, %s271_s20  ;;  %v7_v27 = vld [vmem:[#allocation0] sm:$0x1]  }
  0x24   :  { %9 = vst.msk [vmem:[%s431_s1] sm:$0x1] %vm8_vm0, %v7_v27   ;;  %v166_v28 = vld [vmem:[#allocation0] sm:$0x1]  }
  0x25   :  { %v172_v29 = vld [vmem:[#allocation0] sm:$0x1]  }
  0x26   :  { %95 = vrot.lane.b32.xlu0 %v94_v15, %s272_s21  ;;  %v178_v30 = vld [vmem:[#allocation0] sm:$0x1]  }
  0x27   :  { %101 = vrot.lane.b32.xlu1 %v100_v16, %s273_s22  ;;  %v184_v31 = vld [vmem:[#allocation0] sm:$0x1]  }
  0x28   :  { %v190_v32 = vld [vmem:[#allocation0] sm:$0x1]  }
  0x2a   :  { %107 = vrot.lane.b32.xlu0 %v106_v17, %s274_s23 }
  0x2b   :  { %113 = vrot.lane.b32.xlu1 %v112_v18, %s275_s24 }
  0x2e   :  { %119 = vrot.lane.b32.xlu0 %v118_v19, %s276_s25 }
  0x2f   :  { %125 = vrot.lane.b32.xlu1 %v124_v20, %s277_s26 }
  0x32   :  { %131 = vrot.lane.b32.xlu0 %v130_v21, %s278_s27 }
  0x33   :  { %137 = vrot.lane.b32.xlu1 %v136_v22, %s279_s28 }
  0x36   :  { %143 = vrot.lane.b32.xlu0 %v142_v23, %s280_s29 }
  0x37   :  { %149 = vrot.lane.b32.xlu1 %v148_v24, %s281_s30 }
  0x3a   :  { %155 = vrot.lane.b32.xlu0 %v154_v25, %s282_s4 }
  0x3b   :  { %161 = vrot.lane.b32.xlu1 %v160_v26, %s283_s5 }
  0x3e   :  { %167 = vrot.lane.b32.xlu0 %v166_v28, %s284_s6 }
  0x3f   :  { %173 = vrot.lane.b32.xlu1 %v172_v29, %s285_s7 }
  0x42   :  { %179 = vrot.lane.b32.xlu0 %v178_v30, %s286_s0 }
  0x43   :  { %185 = vrot.lane.b32.xlu1 %v184_v31, %s287_s8 }
  0x46   :  { %191 = vrot.lane.b32.xlu0 %v190_v32, %s288_s9 }
  0x7c   :  { %v12_v33 = vpop.permute.xlu0 %11  }
  0x7d   :  { %v24_v34 = vpop.permute.xlu1 %23   ;;  %196 = vst.msk [vmem:[%s431_s1 + $0x1] sm:$0x1] %vm8_vm0, %v12_v33  }
  0x7e   :  { %198 = vst.msk [vmem:[%s431_s1 + $0x3] sm:$0x1] %vm8_vm0, %v24_v34  }
  0x80   :  { %v18_v35 = vpop.permute.xlu0 %17  }
  0x81   :  { %v30_v36 = vpop.permute.xlu1 %29   ;;  %197 = vst.msk [vmem:[%s431_s1 + $0x2] sm:$0x1] %vm8_vm0, %v18_v35  }
  0x82   :  { %199 = vst.msk [vmem:[%s431_s1 + $0x4] sm:$0x1] %vm8_vm0, %v30_v36  }
  0x84   :  { %v36_v37 = vpop.permute.xlu0 %35  }
  0x85   :  { %v42_v38 = vpop.permute.xlu1 %41   ;;  %200 = vst.msk [vmem:[%s431_s1 + $0x5] sm:$0x1] %vm8_vm0, %v36_v37  }
  0x86   :  { %201 = vst.msk [vmem:[%s431_s1 + $0x6] sm:$0x1] %vm8_vm0, %v42_v38  }
  0x88   :  { %v48_v39 = vpop.permute.xlu0 %47  }
  0x89   :  { %v54_v40 = vpop.permute.xlu1 %53   ;;  %202 = vst.msk [vmem:[%s431_s1 + $0x7] sm:$0x1] %vm8_vm0, %v48_v39  }
  0x8a   :  { %203 = vst.msk [vmem:[%s431_s1 + $0x8] sm:$0x1] %vm8_vm0, %v54_v40  }
  0x8c   :  { %v60_v41 = vpop.permute.xlu0 %59  }
  0x8d   :  { %v66_v42 = vpop.permute.xlu1 %65   ;;  %204 = vst.msk [vmem:[%s431_s1 + $0x9] sm:$0x1] %vm8_vm0, %v60_v41  }
  0x8e   :  { %205 = vst.msk [vmem:[%s431_s1 + $0xa] sm:$0x1] %vm8_vm0, %v66_v42  }
  0x90   :  { %v72_v43 = vpop.permute.xlu0 %71  }
  0x91   :  { %v78_v44 = vpop.permute.xlu1 %77   ;;  %206 = vst.msk [vmem:[%s431_s1 + $0xb] sm:$0x1] %vm8_vm0, %v72_v43  }
  0x92   :  { %207 = vst.msk [vmem:[%s431_s1 + $0xc] sm:$0x1] %vm8_vm0, %v78_v44  }
  0x94   :  { %v84_v45 = vpop.permute.xlu0 %83  }
  0x95   :  { %v90_v46 = vpop.permute.xlu1 %89   ;;  %208 = vst.msk [vmem:[%s431_s1 + $0xd] sm:$0x1] %vm8_vm0, %v84_v45  }
  0x96   :  { %209 = vst.msk [vmem:[%s431_s1 + $0xe] sm:$0x1] %vm8_vm0, %v90_v46  }
  0x98   :  { %v96_v47 = vpop.permute.xlu0 %95  }
  0x99   :  { %v102_v48 = vpop.permute.xlu1 %101   ;;  %210 = vst.msk [vmem:[%s431_s1 + $0xf] sm:$0x1] %vm8_vm0, %v96_v47  }
  0x9a   :  { %211 = vst.msk [vmem:[%s431_s1 + $0x10] sm:$0x1] %vm8_vm0, %v102_v48  }
  0x9c   :  { %v108_v49 = vpop.permute.xlu0 %107  }
  0x9d   :  { %v114_v50 = vpop.permute.xlu1 %113   ;;  %212 = vst.msk [vmem:[%s431_s1 + $0x11] sm:$0x1] %vm8_vm0, %v108_v49  }
  0x9e   :  { %213 = vst.msk [vmem:[%s431_s1 + $0x12] sm:$0x1] %vm8_vm0, %v114_v50  }
  0xa0   :  { %v120_v51 = vpop.permute.xlu0 %119  }
  0xa1   :  { %v126_v52 = vpop.permute.xlu1 %125   ;;  %214 = vst.msk [vmem:[%s431_s1 + $0x13] sm:$0x1] %vm8_vm0, %v120_v51  }
  0xa2   :  { %215 = vst.msk [vmem:[%s431_s1 + $0x14] sm:$0x1] %vm8_vm0, %v126_v52  }
  0xa4   :  { %v132_v53 = vpop.permute.xlu0 %131  }
  0xa5   :  { %v138_v54 = vpop.permute.xlu1 %137   ;;  %216 = vst.msk [vmem:[%s431_s1 + $0x15] sm:$0x1] %vm8_vm0, %v132_v53  }
  0xa6   :  { %217 = vst.msk [vmem:[%s431_s1 + $0x16] sm:$0x1] %vm8_vm0, %v138_v54  }
  0xa8   :  { %v144_v55 = vpop.permute.xlu0 %143  }
  0xa9   :  { %v150_v56 = vpop.permute.xlu1 %149   ;;  %218 = vst.msk [vmem:[%s431_s1 + $0x17] sm:$0x1] %vm8_vm0, %v144_v55  }
  0xaa   :  { %219 = vst.msk [vmem:[%s431_s1 + $0x18] sm:$0x1] %vm8_vm0, %v150_v56  }
  0xac   :  { %v156_v57 = vpop.permute.xlu0 %155  }
  0xad   :  { %v162_v58 = vpop.permute.xlu1 %161   ;;  %220 = vst.msk [vmem:[%s431_s1 + $0x19] sm:$0x1] %vm8_vm0, %v156_v57  }
  0xae   :  { %221 = vst.msk [vmem:[%s431_s1 + $0x1a] sm:$0x1] %vm8_vm0, %v162_v58  }
  0xb0   :  { %v168_v59 = vpop.permute.xlu0 %167  }
  0xb1   :  { %v174_v60 = vpop.permute.xlu1 %173   ;;  %222 = vst.msk [vmem:[%s431_s1 + $0x1b] sm:$0x1] %vm8_vm0, %v168_v59  }
  0xb2   :  { %223 = vst.msk [vmem:[%s431_s1 + $0x1c] sm:$0x1] %vm8_vm0, %v174_v60  }
  0xb4   :  { %v180_v61 = vpop.permute.xlu0 %179  }
  0xb5   :  { %v186_v62 = vpop.permute.xlu1 %185   ;;  %224 = vst.msk [vmem:[%s431_s1 + $0x1d] sm:$0x1] %vm8_vm0, %v180_v61  }
  0xb6   :  { %225 = vst.msk [vmem:[%s431_s1 + $0x1e] sm:$0x1] %vm8_vm0, %v186_v62  }
  0xb8   :  { %v192_v63 = vpop.permute.xlu0 %191  }
  0xb9   :  { %226 = vst.msk [vmem:[%s431_s1 + $0x1f] sm:$0x1] %vm8_vm0, %v192_v63  }

// kernel: upblock_forward.5
= control target key start
LH: loop header
LB: loop body
LE: loop exit
PB: predicated region body
PF: predicated region fallthrough
CT: control target
= control target key end

     0   :  { %s311_s12 = smov 0   ;;  %s334_s0 = inlined_call_operand.vmem [shape: f32[2,32,128], index: 0, kind: input, shape index: {}]   ;;  %s335_s1 = inlined_call_operand.vmem [shape: f32[1,128], index: 1, kind: input, shape index: {}]   ;;  %s336_s2 = inlined_call_operand.vmem [shape: f32[1,128], index: 2, kind: input, shape index: {}]   ;;  %s337_s3 = inlined_call_operand.vmem [shape: f32[2,32,128], index: 3, kind: output, shape index: {}]  }
   0x1 LB: > { %s260_s13 = sadd.s32 4294967295, %s289_s12   ;;  %p264_p0 = scmp.ge.s32.totalorder %s289_s12, 1  ;;  %s289_s12 = sphi %s311_s12, %s13_s12  }
   0x2   : > { %p137_p1 = scmp.lt.s32.totalorder %s289_s12, 3 }
   0x4   : > { %p138_p2 = pnand %p264_p0, %p137_p1 }
   0x5   : > { %p161_p3 = scmp.lt.s32.totalorder (!%p138_p2), %s260_s13, 1 }
   0x6   : > { %141 = sbr.rel (%p138_p2) target bundleno = 23 (0x17), region = 32 }
   0xb   : > { %s339_s13 = smov (!%p161_p3, %s260_s13), 1  ;;  %v269_v0 = vld [vmem:[%s335_s1] ss:$0 sm:$0xff] }
   0xc   : > { %s273_s14 = sshll.u32 %s339_s13, 5  ;;  %v270_v1 = vld [vmem:[%s336_s2] ss:$0 sm:$0xff] }
   0xd   : > { %s165_s19 = scalar_lea.vmem %s334_s0, %s273_s14  ;;  %s170_s24 = scalar_lea.vmem %s337_s3, %s273_s14 }
   0xe   : > { %v171_v2 = vld [vmem:[%s165_s19] sm:$0xff]  ;;  %v172_v3 = vld [vmem:[%s165_s19 + $0x8] sm:$0xff]  ;;  %v173_v4 = vld [vmem:[%s165_s19 + $0x10] sm:$0xff] }
   0xf   : > { %v182_v5 = vmul.f32 %v269_v0, %v171_v2  ;;  %v183_v6 = vmul.f32 %v269_v0, %v172_v3  ;;  %v184_v7 = vmul.f32 %v269_v0, %v173_v4  ;;  %v174_v8 = vld [vmem:[%s165_s19 + $0x18] sm:$0xff] }
  0x10   : > { %v185_v9 = vmul.f32 %v269_v0, %v174_v8 }
  0x11   : > { %v193_v10 = vadd.f32 %v270_v1, %v182_v5  ;;  %v194_v11 = vadd.f32 %v270_v1, %v183_v6  ;;  %v195_v12 = vadd.f32 %v270_v1, %v184_v7 }
  0x12   : > { %v196_v13 = vadd.f32 %v270_v1, %v185_v9 }
  0x13   : > { %v197_v14 = vmax.f32 %v193_v10, 0.0  ;;  %v198_v15 = vmax.f32 %v194_v11, 0.0  ;;  %v199_v16 = vmax.f32 %v195_v12, 0.0 }
  0x14   : > { %v200_v17 = vmax.f32 %v196_v13, 0.0 }
  0x15   : > { %201 = vst [vmem:[%s170_s24] sm:$0xff] %v197_v14  ;;  %202 = vst [vmem:[%s170_s24 + $0x8] sm:$0xff] %v198_v15 }
  0x16   : > { %203 = vst [vmem:[%s170_s24 + $0x10] sm:$0xff] %v199_v16  ;;  %204 = vst [vmem:[%s170_s24 + $0x18] sm:$0xff] %v200_v17 }
  0x17 PF: > { %s13_s12 = sadd.s32 1, %s289_s12  }
  0x18   : > { %p10_p4 = scmp.ge.s32.totalorder %s13_s12, 4  }
  0x1a   :  { %12 = sbr.rel (!%p10_p4) target bundleno = 1 (0x1), region = 62 }

</bundles_post_ra>
